<compile_context>
chip_gen: v7x
topology: tpu7x:2x2x1
jax: 0.10.0
libtpu: 0.0.40
codegen_flags: <defaults>
</compile_context>

<pallas_src>
import functools

import jax
import jax.numpy as jnp
import numpy as np
from jax import lax
from jax.experimental import pallas as pl
from jax.experimental.pallas import tpu as pltpu


def _output_projection_kernel(x_ref, w_ref, b_ref, o_ref, *, H, W, HW, Nb):
    # x_ref: (Nb, HW, Cin)   NHWC input block, spatial flattened (no wrapper
    #                        transpose -- the permute is fused here)
    # w_ref: (9, Cout, Cin)  per-tap weight matrices, tap index = kh*3 + kw
    # b_ref: (Cout, 1)       f32 bias column
    # o_ref: (Nb, Cout, HW)  NCHW output block; (Cout, HW) lane-dense stores
    Cin = x_ref.shape[-1]
    Cout = w_ref.shape[1]
    L = Nb * HW

    # Fused NHWC->NCHW: one in-kernel XLU transpose (XLU is nearly idle here),
    # instead of a separate HBM transpose pass in the wrapper.
    x_cm = jnp.transpose(x_ref[...].reshape(L, Cin), (1, 0))        # (Cin, L)

    # Boundary predicates generated in-kernel from a lane iota.  All index
    # arithmetic is f32 (exact at these magnitudes) to stay on ops with
    # guaranteed TPU vector lowerings (no vector integer div/rem).
    pos = lax.broadcasted_iota(jnp.int32, (1, L), 1).astype(jnp.float32)
    p_img = pos if Nb == 1 else pos - jnp.floor(pos / HW) * HW   # pos in image
    col = p_img - jnp.floor(p_img / W) * W                       # column index
    row_has_above = p_img >= W                                   # dh = -1 valid
    row_has_below = p_img < (H - 1) * W                          # dh = +1 valid
    col_has_left = col >= 1                                      # dw = -1 valid
    col_has_right = col <= W - 2                                 # dw = +1 valid

    acc = jnp.zeros((Cout, L), jnp.float32)
    for kh in range(3):
        for kw in range(3):
            dh, dw = kh - 1, kw - 1
            shift = dh * W + dw                    # flattened spatial offset
            tap_w = w_ref[kh * 3 + kw]             # (Cout, Cin)
            if shift == 0:                         # center tap: no shift/mask
                acc = acc + jnp.dot(tap_w, x_cm,
                                    preferred_element_type=jnp.float32)
                continue
            rolled = pltpu.roll(x_cm, shift=(-shift) % L, axis=1)
            contrib = jnp.dot(tap_w, rolled,
                              preferred_element_type=jnp.float32)  # (Cout, L)
            conds = []
            if dh == -1:
                conds.append(row_has_above)
            if dh == 1:
                conds.append(row_has_below)
            if dw == -1:
                conds.append(col_has_left)
            if dw == 1:
                conds.append(col_has_right)
            valid = conds[0]
            for c in conds[1:]:
                valid = jnp.logical_and(valid, c)
            # Post-matmul masking: selects over (Cout, L), not (Cin, L); the
            # same masks also zero any cross-image wrap when Nb > 1.
            acc = acc + jnp.where(valid, contrib, 0.0)

    acc = acc + b_ref[...]                         # f32 bias column broadcast

    # Per-image (Cout, HW) lane-dense stores of the NCHW output block.
    for b in range(Nb):
        o_ref[b] = acc[:, b * HW:(b + 1) * HW].astype(o_ref.dtype)


def _pick_batch_block(N, HW, Cin, itemsize):
    """Images per grid step: largest divisor of N that (a) keeps the input
    block under a conservative VMEM budget and (b) leaves >= 2 grid steps so
    v7x's two TensorCores both get work (v5e/v6e are single-TC)."""
    budget = 4 * 1024 * 1024                       # per input block (x2 bufs)
    max_nb_mem = max(1, budget // (HW * Cin * itemsize))
    nb = 1
    for cand in range(1, N + 1):
        if N % cand:
            continue
        if cand > max_nb_mem:
            break
        if N >= 2 and N // cand < 2:
            break
        nb = cand
    return nb


@jax.jit
def output_projection(x_nhwc, weight, bias):
    """Forward pass of OutputProjection.

    x_nhwc: (N, H, W, Cin)     module input (it permutes to NCHW internally)
    weight: (Cout, Cin, 3, 3)  torch.nn.Conv2d weight layout
    bias:   (Cout,)
    returns (N, Cout, H, W)    NCHW, like the module
    """
    N, H, W, Cin = x_nhwc.shape
    Cout = weight.shape[0]
    HW = H * W

    # Free reshape only -- the NHWC->NCHW permute happens inside the kernel.
    x_flat = x_nhwc.reshape(N, HW, Cin)

    # Weight as 9 per-tap (Cout, Cin) matrices, cast to the activation dtype
    # (pass bf16 activations/weights for native-rate MXU on v6e/v7x).
    w9 = jnp.transpose(weight, (2, 3, 0, 1)).reshape(9, Cout, Cin)
    w9 = w9.astype(x_nhwc.dtype)
    b_col = bias.reshape(Cout, 1).astype(jnp.float32)

    nb = _pick_batch_block(N, HW, Cin, x_nhwc.dtype.itemsize)
    grid = (N // nb,)

    kernel = functools.partial(_output_projection_kernel,
                               H=H, W=W, HW=HW, Nb=nb)

    # TODO(synk): for very large H*W (block > ~4 MiB), add whole-row spatial
    # tiling with a +/-1-row halo so the per-step block fits v7x's 64 MiB VMEM.
    out_flat = pl.pallas_call(
        kernel,
        out_shape=jax.ShapeDtypeStruct((N, Cout, HW), x_nhwc.dtype),
        grid_spec=pltpu.PrefetchScalarGridSpec(
            num_scalar_prefetch=0,
            grid=grid,
            in_specs=[
                pl.BlockSpec((nb, HW, Cin), lambda n: (n, 0, 0)),
                pl.BlockSpec((9, Cout, Cin), lambda n: (0, 0, 0)),
                pl.BlockSpec((Cout, 1), lambda n: (0, 0)),
            ],
            out_specs=pl.BlockSpec((nb, Cout, HW), lambda n: (n, 0, 0)),
        ),
        compiler_params=pltpu.CompilerParams(
            dimension_semantics=("parallel",),
            vmem_limit_bytes=48 * 1024 * 1024),
    )(x_flat, w9, b_col)

    return out_flat.reshape(N, Cout, H, W)


def _reference(x_nhwc, weight, bias):
    """Independent reference: XLA conv in NHWC/HWIO, permuted to NCHW."""
    w_hwio = jnp.transpose(weight, (2, 3, 1, 0)).astype(jnp.float32)
    y = lax.conv_general_dilated(
        x_nhwc.astype(jnp.float32), w_hwio,
        window_strides=(1, 1), padding=[(1, 1), (1, 1)],
        dimension_numbers=("NHWC", "HWIO", "NHWC"),
        precision=lax.Precision.HIGHEST)
    y = y + bias.reshape(1, 1, 1, -1)
    return jnp.transpose(y, (0, 3, 1, 2))


if __name__ == "__main__":
    key = jax.random.PRNGKey(0)
    k_x, k_w, k_b = jax.random.split(key, 3)

    N, H, W = 2, 16, 16
    in_channel, out_channel = 64, 3   # module defaults

    # Module forward input is NHWC (it permutes to NCHW internally).
    x = jax.random.normal(k_x, (N, H, W, in_channel), jnp.float32)
    # Deterministic synthetic parameters (Conv2d weight layout: (out, in, 3, 3)).
    fan_in = in_channel * 9
    bound = 1.0 / np.sqrt(fan_in)
    weight = jax.random.uniform(k_w, (out_channel, in_channel, 3, 3),
                                jnp.float32, minval=-bound, maxval=bound)
    bias = jax.random.uniform(k_b, (out_channel,), jnp.float32,
                              minval=-bound, maxval=bound)

    out = jax.block_until_ready(output_projection(x, weight, bias))
    assert out.shape == (N, out_channel, H, W)

    ref = _reference(x, weight, bias)
    np.testing.assert_allclose(np.asarray(out), np.asarray(ref),
                               rtol=1e-4, atol=1e-4)
    print("KERNEL_OK")
</pallas_src>

<mosaic_0001>
module attributes {stable_mosaic.version = 11 : i64} {
  func.func @_output_projection_kernel(%arg0: i32, %arg1: memref<1x256x64xf32, #tpu.memory_space<vmem>>, %arg2: memref<9x3x64xf32, #tpu.memory_space<vmem>>, %arg3: memref<3x1xf32, #tpu.memory_space<vmem>>, %arg4: memref<1x3x256xf32, #tpu.memory_space<vmem>>) attributes {dimension_semantics = [#tpu.dimension_semantics<parallel>], iteration_bounds = array<i64: 2>, scalar_prefetch = 0 : i64, scratch_operands = 0 : i64, tpu.core_type = #tpu.core_type<tc>, window_params = [{transform_indices = @transform_0, window_bounds = array<i64: 1, 256, 64>}, {pipeline_mode = #tpu.pipeline_mode<synchronous>, transform_indices = @transform_1, window_bounds = array<i64: 9, 3, 64>}, {pipeline_mode = #tpu.pipeline_mode<synchronous>, transform_indices = @transform_2, window_bounds = array<i64: 3, 1>}, {transform_indices = @transform_3, window_bounds = array<i64: 1, 3, 256>}]} {
    %c0 = arith.constant 0 : index
    %c0_0 = arith.constant 0 : index
    %c0_1 = arith.constant 0 : index
    %0 = vector.load %arg1[%c0, %c0_0, %c0_1] : memref<1x256x64xf32, #tpu.memory_space<vmem>>, vector<1x256x64xf32>
    %1 = vector.shape_cast %0 : vector<1x256x64xf32> to vector<256x64xf32>
    %2 = tpu.transpose %1, [1, 0] : vector<256x64xf32> -> vector<64x256xf32>
    %3 = tpu.iota {dimensions = array<i32: 1>} : vector<1x256xi32>
    %4 = arith.sitofp %3 : vector<1x256xi32> to vector<1x256xf32>
    %cst = arith.constant 1.600000e+01 : f32
    %5 = vector.broadcast %cst : f32 to vector<1x256xf32>
    %6 = arith.divf %4, %5 : vector<1x256xf32>
    %7 = math.floor %6 : vector<1x256xf32>
    %cst_2 = arith.constant 1.600000e+01 : f32
    %8 = vector.broadcast %cst_2 : f32 to vector<1x256xf32>
    %9 = arith.mulf %7, %8 : vector<1x256xf32>
    %10 = arith.subf %4, %9 : vector<1x256xf32>
    %cst_3 = arith.constant 1.600000e+01 : f32
    %11 = vector.broadcast %cst_3 : f32 to vector<1x256xf32>
    %12 = arith.cmpf oge, %4, %11 : vector<1x256xf32>
    %cst_4 = arith.constant 2.400000e+02 : f32
    %13 = vector.broadcast %cst_4 : f32 to vector<1x256xf32>
    %14 = arith.cmpf olt, %4, %13 : vector<1x256xf32>
    %cst_5 = arith.constant 1.000000e+00 : f32
    %15 = vector.broadcast %cst_5 : f32 to vector<1x256xf32>
    %16 = arith.cmpf oge, %10, %15 : vector<1x256xf32>
    %cst_6 = arith.constant 1.400000e+01 : f32
    %17 = vector.broadcast %cst_6 : f32 to vector<1x256xf32>
    %18 = arith.cmpf ole, %10, %17 : vector<1x256xf32>
    %cst_7 = arith.constant 0.000000e+00 : f32
    %19 = vector.broadcast %cst_7 : f32 to vector<3x256xf32>
    %c0_8 = arith.constant 0 : index
    %c0_9 = arith.constant 0 : index
    %c0_10 = arith.constant 0 : index
    %20 = vector.load %arg2[%c0_8, %c0_9, %c0_10] : memref<9x3x64xf32, #tpu.memory_space<vmem>>, vector<1x3x64xf32>
    %21 = vector.shape_cast %20 : vector<1x3x64xf32> to vector<3x64xf32>
    %c17_i32 = arith.constant 17 : i32
    %22 = tpu.dynamic_rotate %2 by %c17_i32 dim 1 : vector<64x256xf32>, i32 -> vector<64x256xf32>
    %cst_11 = arith.constant dense<0.000000e+00> : vector<3x256xf32>
    %23 = tpu.matmul %21, %22, %cst_11 {dimension_numbers = #tpu.dot_dimension_numbers<[1], [0], [0], [1], [0, 0, 1, 1], [], []>} : vector<3x64xf32>, vector<64x256xf32>, vector<3x256xf32> -> vector<3x256xf32>
    %24 = arith.andi %12, %16 : vector<1x256xi1>
    %cst_12 = arith.constant 0.000000e+00 : f32
    %25 = vector.shape_cast %24 : vector<1x256xi1> to vector<1x256xi1>
    %26 = vector.broadcast %25 : vector<1x256xi1> to vector<3x256xi1>
    %27 = vector.broadcast %cst_12 : f32 to vector<3x256xf32>
    %28 = arith.select %26, %23, %27 : vector<3x256xi1>, vector<3x256xf32>
    %29 = arith.addf %19, %28 : vector<3x256xf32>
    %c1 = arith.constant 1 : index
    %c0_13 = arith.constant 0 : index
    %c0_14 = arith.constant 0 : index
    %30 = vector.load %arg2[%c1, %c0_13, %c0_14] : memref<9x3x64xf32, #tpu.memory_space<vmem>>, vector<1x3x64xf32>
    %31 = vector.shape_cast %30 : vector<1x3x64xf32> to vector<3x64xf32>
    %c16_i32 = arith.constant 16 : i32
    %32 = tpu.dynamic_rotate %2 by %c16_i32 dim 1 : vector<64x256xf32>, i32 -> vector<64x256xf32>
    %cst_15 = arith.constant dense<0.000000e+00> : vector<3x256xf32>
    %33 = tpu.matmul %31, %32, %cst_15 {dimension_numbers = #tpu.dot_dimension_numbers<[1], [0], [0], [1], [0, 0, 1, 1], [], []>} : vector<3x64xf32>, vector<64x256xf32>, vector<3x256xf32> -> vector<3x256xf32>
    %cst_16 = arith.constant 0.000000e+00 : f32
    %34 = vector.shape_cast %12 : vector<1x256xi1> to vector<1x256xi1>
    %35 = vector.broadcast %34 : vector<1x256xi1> to vector<3x256xi1>
    %36 = vector.broadcast %cst_16 : f32 to vector<3x256xf32>
    %37 = arith.select %35, %33, %36 : vector<3x256xi1>, vector<3x256xf32>
    %38 = arith.addf %29, %37 : vector<3x256xf32>
    %c2 = arith.constant 2 : index
    %c0_17 = arith.constant 0 : index
    %c0_18 = arith.constant 0 : index
    %39 = vector.load %arg2[%c2, %c0_17, %c0_18] : memref<9x3x64xf32, #tpu.memory_space<vmem>>, vector<1x3x64xf32>
    %40 = vector.shape_cast %39 : vector<1x3x64xf32> to vector<3x64xf32>
    %c15_i32 = arith.constant 15 : i32
    %41 = tpu.dynamic_rotate %2 by %c15_i32 dim 1 : vector<64x256xf32>, i32 -> vector<64x256xf32>
    %cst_19 = arith.constant dense<0.000000e+00> : vector<3x256xf32>
    %42 = tpu.matmul %40, %41, %cst_19 {dimension_numbers = #tpu.dot_dimension_numbers<[1], [0], [0], [1], [0, 0, 1, 1], [], []>} : vector<3x64xf32>, vector<64x256xf32>, vector<3x256xf32> -> vector<3x256xf32>
    %43 = arith.andi %12, %18 : vector<1x256xi1>
    %cst_20 = arith.constant 0.000000e+00 : f32
    %44 = vector.shape_cast %43 : vector<1x256xi1> to vector<1x256xi1>
    %45 = vector.broadcast %44 : vector<1x256xi1> to vector<3x256xi1>
    %46 = vector.broadcast %cst_20 : f32 to vector<3x256xf32>
    %47 = arith.select %45, %42, %46 : vector<3x256xi1>, vector<3x256xf32>
    %48 = arith.addf %38, %47 : vector<3x256xf32>
    %c3 = arith.constant 3 : index
    %c0_21 = arith.constant 0 : index
    %c0_22 = arith.constant 0 : index
    %49 = vector.load %arg2[%c3, %c0_21, %c0_22] : memref<9x3x64xf32, #tpu.memory_space<vmem>>, vector<1x3x64xf32>
    %50 = vector.shape_cast %49 : vector<1x3x64xf32> to vector<3x64xf32>
    %c1_i32 = arith.constant 1 : i32
    %51 = tpu.dynamic_rotate %2 by %c1_i32 dim 1 : vector<64x256xf32>, i32 -> vector<64x256xf32>
    %cst_23 = arith.constant dense<0.000000e+00> : vector<3x256xf32>
    %52 = tpu.matmul %50, %51, %cst_23 {dimension_numbers = #tpu.dot_dimension_numbers<[1], [0], [0], [1], [0, 0, 1, 1], [], []>} : vector<3x64xf32>, vector<64x256xf32>, vector<3x256xf32> -> vector<3x256xf32>
    %cst_24 = arith.constant 0.000000e+00 : f32
    %53 = vector.shape_cast %16 : vector<1x256xi1> to vector<1x256xi1>
    %54 = vector.broadcast %53 : vector<1x256xi1> to vector<3x256xi1>
    %55 = vector.broadcast %cst_24 : f32 to vector<3x256xf32>
    %56 = arith.select %54, %52, %55 : vector<3x256xi1>, vector<3x256xf32>
    %57 = arith.addf %48, %56 : vector<3x256xf32>
    %c4 = arith.constant 4 : index
    %c0_25 = arith.constant 0 : index
    %c0_26 = arith.constant 0 : index
    %58 = vector.load %arg2[%c4, %c0_25, %c0_26] : memref<9x3x64xf32, #tpu.memory_space<vmem>>, vector<1x3x64xf32>
    %59 = vector.shape_cast %58 : vector<1x3x64xf32> to vector<3x64xf32>
    %cst_27 = arith.constant dense<0.000000e+00> : vector<3x256xf32>
    %60 = tpu.matmul %59, %2, %cst_27 {dimension_numbers = #tpu.dot_dimension_numbers<[1], [0], [0], [1], [0, 0, 1, 1], [], []>} : vector<3x64xf32>, vector<64x256xf32>, vector<3x256xf32> -> vector<3x256xf32>
    %61 = arith.addf %57, %60 : vector<3x256xf32>
    %c5 = arith.constant 5 : index
    %c0_28 = arith.constant 0 : index
    %c0_29 = arith.constant 0 : index
    %62 = vector.load %arg2[%c5, %c0_28, %c0_29] : memref<9x3x64xf32, #tpu.memory_space<vmem>>, vector<1x3x64xf32>
    %63 = vector.shape_cast %62 : vector<1x3x64xf32> to vector<3x64xf32>
    %c255_i32 = arith.constant 255 : i32
    %64 = tpu.dynamic_rotate %2 by %c255_i32 dim 1 : vector<64x256xf32>, i32 -> vector<64x256xf32>
    %cst_30 = arith.constant dense<0.000000e+00> : vector<3x256xf32>
    %65 = tpu.matmul %63, %64, %cst_30 {dimension_numbers = #tpu.dot_dimension_numbers<[1], [0], [0], [1], [0, 0, 1, 1], [], []>} : vector<3x64xf32>, vector<64x256xf32>, vector<3x256xf32> -> vector<3x256xf32>
    %cst_31 = arith.constant 0.000000e+00 : f32
    %66 = vector.shape_cast %18 : vector<1x256xi1> to vector<1x256xi1>
    %67 = vector.broadcast %66 : vector<1x256xi1> to vector<3x256xi1>
    %68 = vector.broadcast %cst_31 : f32 to vector<3x256xf32>
    %69 = arith.select %67, %65, %68 : vector<3x256xi1>, vector<3x256xf32>
    %70 = arith.addf %61, %69 : vector<3x256xf32>
    %c6 = arith.constant 6 : index
    %c0_32 = arith.constant 0 : index
    %c0_33 = arith.constant 0 : index
    %71 = vector.load %arg2[%c6, %c0_32, %c0_33] : memref<9x3x64xf32, #tpu.memory_space<vmem>>, vector<1x3x64xf32>
    %72 = vector.shape_cast %71 : vector<1x3x64xf32> to vector<3x64xf32>
    %c241_i32 = arith.constant 241 : i32
    %73 = tpu.dynamic_rotate %2 by %c241_i32 dim 1 : vector<64x256xf32>, i32 -> vector<64x256xf32>
    %cst_34 = arith.constant dense<0.000000e+00> : vector<3x256xf32>
    %74 = tpu.matmul %72, %73, %cst_34 {dimension_numbers = #tpu.dot_dimension_numbers<[1], [0], [0], [1], [0, 0, 1, 1], [], []>} : vector<3x64xf32>, vector<64x256xf32>, vector<3x256xf32> -> vector<3x256xf32>
    %75 = arith.andi %14, %16 : vector<1x256xi1>
    %cst_35 = arith.constant 0.000000e+00 : f32
    %76 = vector.shape_cast %75 : vector<1x256xi1> to vector<1x256xi1>
    %77 = vector.broadcast %76 : vector<1x256xi1> to vector<3x256xi1>
    %78 = vector.broadcast %cst_35 : f32 to vector<3x256xf32>
    %79 = arith.select %77, %74, %78 : vector<3x256xi1>, vector<3x256xf32>
    %80 = arith.addf %70, %79 : vector<3x256xf32>
    %c7 = arith.constant 7 : index
    %c0_36 = arith.constant 0 : index
    %c0_37 = arith.constant 0 : index
    %81 = vector.load %arg2[%c7, %c0_36, %c0_37] : memref<9x3x64xf32, #tpu.memory_space<vmem>>, vector<1x3x64xf32>
    %82 = vector.shape_cast %81 : vector<1x3x64xf32> to vector<3x64xf32>
    %c240_i32 = arith.constant 240 : i32
    %83 = tpu.dynamic_rotate %2 by %c240_i32 dim 1 : vector<64x256xf32>, i32 -> vector<64x256xf32>
    %cst_38 = arith.constant dense<0.000000e+00> : vector<3x256xf32>
    %84 = tpu.matmul %82, %83, %cst_38 {dimension_numbers = #tpu.dot_dimension_numbers<[1], [0], [0], [1], [0, 0, 1, 1], [], []>} : vector<3x64xf32>, vector<64x256xf32>, vector<3x256xf32> -> vector<3x256xf32>
    %cst_39 = arith.constant 0.000000e+00 : f32
    %85 = vector.shape_cast %14 : vector<1x256xi1> to vector<1x256xi1>
    %86 = vector.broadcast %85 : vector<1x256xi1> to vector<3x256xi1>
    %87 = vector.broadcast %cst_39 : f32 to vector<3x256xf32>
    %88 = arith.select %86, %84, %87 : vector<3x256xi1>, vector<3x256xf32>
    %89 = arith.addf %80, %88 : vector<3x256xf32>
    %c8 = arith.constant 8 : index
    %c0_40 = arith.constant 0 : index
    %c0_41 = arith.constant 0 : index
    %90 = vector.load %arg2[%c8, %c0_40, %c0_41] : memref<9x3x64xf32, #tpu.memory_space<vmem>>, vector<1x3x64xf32>
    %91 = vector.shape_cast %90 : vector<1x3x64xf32> to vector<3x64xf32>
    %c239_i32 = arith.constant 239 : i32
    %92 = tpu.dynamic_rotate %2 by %c239_i32 dim 1 : vector<64x256xf32>, i32 -> vector<64x256xf32>
    %cst_42 = arith.constant dense<0.000000e+00> : vector<3x256xf32>
    %93 = tpu.matmul %91, %92, %cst_42 {dimension_numbers = #tpu.dot_dimension_numbers<[1], [0], [0], [1], [0, 0, 1, 1], [], []>} : vector<3x64xf32>, vector<64x256xf32>, vector<3x256xf32> -> vector<3x256xf32>
    %94 = arith.andi %14, %18 : vector<1x256xi1>
    %cst_43 = arith.constant 0.000000e+00 : f32
    %95 = vector.shape_cast %94 : vector<1x256xi1> to vector<1x256xi1>
    %96 = vector.broadcast %95 : vector<1x256xi1> to vector<3x256xi1>
    %97 = vector.broadcast %cst_43 : f32 to vector<3x256xf32>
    %98 = arith.select %96, %93, %97 : vector<3x256xi1>, vector<3x256xf32>
    %99 = arith.addf %89, %98 : vector<3x256xf32>
    %c0_44 = arith.constant 0 : index
    %c0_45 = arith.constant 0 : index
    %100 = vector.load %arg3[%c0_44, %c0_45] : memref<3x1xf32, #tpu.memory_space<vmem>>, vector<3x1xf32>
    %101 = vector.broadcast %100 : vector<3x1xf32> to vector<3x256xf32>
    %102 = arith.addf %99, %101 : vector<3x256xf32>
    %c0_46 = arith.constant 0 : index
    %c0_47 = arith.constant 0 : index
    %c0_48 = arith.constant 0 : index
    %103 = vector.load %arg4[%c0_46, %c0_47, %c0_48] : memref<1x3x256xf32, #tpu.memory_space<vmem>>, vector<1x3x256xf32>
    %104 = vector.shape_cast %103 : vector<1x3x256xf32> to vector<3x256xf32>
    %105 = vector.shape_cast %102 : vector<3x256xf32> to vector<1x3x256xf32>
    tpu.vector_store %arg4[%c0_46, %c0_47, %c0_48], %105 {strides = array<i32>} : memref<1x3x256xf32, #tpu.memory_space<vmem>>, vector<1x3x256xf32>,
    return
  }
  func.func @transform_0(%arg0: i32) -> (i32, i32, i32) {
    %c0_i32 = arith.constant 0 : i32
    %c0_i32_0 = arith.constant 0 : i32
    %c0_i32_1 = arith.constant 0 : i32
    return %arg0, %c0_i32, %c0_i32_0 : i32, i32, i32
  }
  func.func @transform_1(%arg0: i32) -> (i32, i32, i32) {
    %c0_i32 = arith.constant 0 : i32
    %c0_i32_0 = arith.constant 0 : i32
    %c0_i32_1 = arith.constant 0 : i32
    %c0_i32_2 = arith.constant 0 : i32
    return %c0_i32, %c0_i32_0, %c0_i32_1 : i32, i32, i32
  }
  func.func @transform_2(%arg0: i32) -> (i32, i32) {
    %c0_i32 = arith.constant 0 : i32
    %c0_i32_0 = arith.constant 0 : i32
    %c0_i32_1 = arith.constant 0 : i32
    return %c0_i32, %c0_i32_0 : i32, i32
  }
  func.func @transform_3(%arg0: i32) -> (i32, i32, i32) {
    %c0_i32 = arith.constant 0 : i32
    %c0_i32_0 = arith.constant 0 : i32
    %c0_i32_1 = arith.constant 0 : i32
    return %arg0, %c0_i32, %c0_i32_0 : i32, i32, i32
  }
}

</mosaic_0001>

<bundles_post_ra>
// kernel: output_projection.1
= control target key start
LH: loop header
LB: loop body
LE: loop exit
PB: predicated region body
PF: predicated region fallthrough
CT: control target
= control target key end

     0   :  { %8 = vsyncpa [#allocation3], 0  ;;  %s3129_s0 = inlined_call_operand.hbm [shape: f32[2,256,64], index: 0, kind: input, shape index: {}]   ;;  %s3130_s1 = inlined_call_operand.vmem [shape: f32[9,3,64], index: 1, kind: input, shape index: {}]   ;;  %s3131_s2 = inlined_call_operand.vmem [shape: f32[3,1], index: 2, kind: input, shape index: {}]   ;;  %s3132_s3 = inlined_call_operand.vmem [shape: f32[2,3,256], index: 3, kind: output, shape index: {}]  }
   0x1   :  { %10 = vsyncpa [#allocation3 + $0x1], 0  ;;  %s2257_s12 = smov 0   ;;  %s2259_s13 = smov 0  }
   0x2   :  { %s2261_s14 = smov 0   ;;  %s2263_s15 = smov 0  }
   0x3 LB: > { %s2276_s16 = sadd.s32 4294967295, %s2222_s15   ;;  %s2279_s17 = sadd.s32 1, %s2222_s15   ;;  %s2222_s15 = sphi %s2263_s15, %s3152_s15   ;;  %s2218_s14 = sphi %s2261_s14, %s3151_s14   ;;  %s2214_s13 = sphi %s2259_s13, %s3150_s13   ;;  %s2210_s12 = sphi %s2257_s12, %s3149_s12  }
   0x4   : > { %s20_s18 = ssub.s32 %s2222_s15, %s2279_s17  ;;  %s23_s19 = sadd.s32 1, %s2218_s14 }
   0x5   : > { %p21_p0 = scmp.eq.s32.totalorder %s20_s18, 0  ;;  %p30_p1 = scmp.ne.s32.totalorder %s2218_s14, %s2214_s13 }
   0x6   : > { %p31_p2 = scmp.eq.s32.totalorder %s2222_s15, 0  ;;  %p36_p3 = scmp.ne.s32.totalorder %s2214_s13, %s2210_s12 }
   0x7   : > { %s2289_s20 = scalar_select %p21_p0, %s2218_s14, %s23_s19  }
   0x8   : > { %p32_p4 = por %p31_p2, %p30_p1  ;;  %p37_p5 = scmp.eq.s32.totalorder %s2276_s16, 0 }
   0x9   : > { %p1720_p6 = scmp.lt.s32.totalorder %s2222_s15, 2  ;;  %s134_s22 = sand.u32 1, %s2218_s14  }
   0xa   : > { %p2293_p7 = por %p37_p5, %p36_p3  ;;  %s1542_s23 = sshll.u32 %s134_s22, 8 }
   0xb   : > { %s1568_s24 = sshll.u32 %s2222_s15, 12  ;;  %s138_s28 = scalar_lea.vmem [#allocation2], %s1542_s23 }
   0xc   : > { %s2302_s27 = scalar_lea.hbm %s3129_s0, %s1568_s24  ;;  %s145_s29 = sshll.u32 %s138_s28, 4  ;;  %s2304_s29 = int_to_ptr.vmem [resolvable:$true] %s145_s29 }
   0xd   : > { %p2306_p8 = pnand %p1720_p6, %p32_p4  ;;  %s2311_s4 = scalar_lea.sflag [#allocation3], %s134_s22 }
   0xe   : > { %s2158_s5 = scalar_lea.hbm %s2302_s27, 4096  ;;  %s2163_s8 = scalar_lea.hbm %s3129_s0, 8192 }
   0xf   : > { %p2159_p10 = scmp.ne.s32.totalorder %s2302_s27, %s2158_s5  ;;  %p2160_p11 = pneg %p2306_p8 }
  0x10   : > { %p2164_p0 = scmp.lt.u32.totalorder %s2302_s27, %s3129_s0  ;;  %p2165_p1 = scmp.lt.u32.totalorder %s2163_s8, %s2158_s5 }
  0x11   : > { %p2161_p12 = pnand %p2160_p11, %p2159_p10  ;;  %p2167_p3 = scmp.lt.u32.totalorder %s2158_s5, %s2302_s27 }
  0x12   : > { %p2166_p2 = por %p2165_p1, %p2164_p0 }
  0x13   : > { %p2162_p13 = pneg %p2161_p12 }
  0x14   : > { %p2168_p4 = por %p2167_p3, %p2166_p2 }
  0x16   : > { %p2169_p5 = pnand %p2168_p4, %p2162_p13 }
  0x18   : > { %2172 = shalt.err (!%p2169_p5)
}
  0x19   : > { %s2173_s11 = scalar_lea.vmem %s2304_s29, 4096  ;;  %s2224_s12 = smov [#allocation2]  }
  0x1a   : > { %p2174_p6 = scmp.ne.s32.totalorder %s2304_s29, %s2173_s11  ;;  %s2178_s18 = sshll.u32 %s2224_s12, 4  ;;  %s2179_s18 = int_to_ptr.vmem [resolvable:$false] %s2178_s18 }
  0x1b   : > { %s2180_s19 = scalar_lea.vmem %s2179_s18, 8192  ;;  %p2181_p9 = scmp.lt.s32.totalorder %s2304_s29, %s2179_s18 }
  0x1c   : > { %p2176_p10 = pnand %p2174_p6, %p2160_p11  ;;  %p2182_p0 = scmp.lt.s32.totalorder %s2180_s19, %s2173_s11 }
  0x1e   : > { %p2177_p12 = pneg %p2176_p10  ;;  %p2183_p1 = por %p2182_p0, %p2181_p9 }
  0x20   : > { %p2184_p2 = pnand %p2183_p1, %p2177_p12 }
  0x22   : > { %2187 = shalt.err (!%p2184_p2)
}
  0x23   : > { %s2225_s22 = smov 128   ;;  %s2226_s23 = smov 8  }
  0x24   : > { %1719 = dma.hbm_to_vmem [thread:$0]  (!%p2306_p8), %s2302_s27, 4096, %s2304_s29, %s2311_s4, %s2225_s22, %s2225_s22, %s2226_s23  }
  0x25   : > { %p153_p11 = scmp.lt.s32.totalorder %s2222_s15, 3  ;;  %p3137_p13 = scmp.ge.s32.totalorder %s2222_s15, 1 }
  0x27   : > { %p154_p3 = pnand %p3137_p13, %p153_p11 }
  0x28   : > { %s159_s24 = sand.u32 (!%p154_p3), 1, %s2214_s13  }
  0x29   : > { %157 = sbr.rel (%p154_p3) target bundleno = 712 (0x2c8), region = 32  ;;  %s1546_s25 = sshll.u32 (!%p154_p3), %s159_s24, 8 }
  0x2a   : > { %s160_s26 = scalar_lea.sflag (!%p154_p3), [#allocation3], %s159_s24  ;;  %s2343_s28 = scalar_lea.vmem (!%p154_p3), [#allocation2], %s1546_s25 }
  0x30   : > { %2205 = dma.done.wait (%p2293_p7), %s160_s26, 4096  }
  0x31   : > { %2207 = vsyncadd (%p2293_p7), %s160_s26, 4294963200  ;;  %v191_v0 = vld [vmem:[%s2343_s28] sm:$0xff]  ;;  %v192_v2 = vld [vmem:[%s2343_s28 + $0x8] sm:$0xff]  ;;  %s2227_s15 = smov 127   ;;  %s2228_s21 = smov 17   ;;  %vm359_vm6 = vcmask 523264  }
  0x32   : > { %v207_v1 = vld [vmem:[%s2343_s28 + $0x80] sm:$0xff]  ;;  %v208_v4 = vld [vmem:[%s2343_s28 + $0x88] sm:$0xff]  ;;  %v193_v6 = vld [vmem:[%s2343_s28 + $0x10] sm:$0xff]  ;;  %s2229_s27 = smov 113   ;;  %s2230_s29 = smov 16  }
  0x33   : > { %v1765_v3 = vpack.i.bf16 %v207_v1, %v191_v0  ;;  %v1767_v5 = vpack.i.bf16 %v208_v4, %v192_v2  ;;  %v209_v7 = vld [vmem:[%s2343_s28 + $0x90] sm:$0xff]  ;;  %v194_v9 = vld [vmem:[%s2343_s28 + $0x18] sm:$0xff]  ;;  %v195_v12 = vld [vmem:[%s2343_s28 + $0x20] sm:$0xff]  ;;  %s2231_s30 = smov 15   ;;  %s2232_s4 = smov 1  }
  0x34   : > { %v1769_v8 = vpack.i.bf16 %v209_v7, %v193_v6  ;;  %v210_v10 = vld [vmem:[%s2343_s28 + $0x98] sm:$0xff]  ;;  %v211_v13 = vld [vmem:[%s2343_s28 + $0xa0] sm:$0xff]  ;;  %v196_v15 = vld [vmem:[%s2343_s28 + $0x28] sm:$0xff]  ;;  %s2233_s5 = smov 112   ;;  %s2234_s6 = smov 111  }
  0x35   : > { %1766 = vxpose.xlu0.b32.start [1/16] (narrow) %v1765_v3, 64  ;;  %v1771_v11 = vpack.i.bf16 %v210_v10, %v194_v9  ;;  %v1773_v14 = vpack.i.bf16 %v211_v13, %v195_v12  ;;  %v212_v16 = vld [vmem:[%s2343_s28 + $0xa8] sm:$0xff]  ;;  %v197_v18 = vld [vmem:[%s2343_s28 + $0x30] sm:$0xff]  ;;  %v198_v21 = vld [vmem:[%s2343_s28 + $0x38] sm:$0xff]  ;;  %p186_p7 = scmp.lt.s32.totalorder %s2276_s16, 1 }
  0x36   : > { %v1775_v17 = vpack.i.bf16 %v212_v16, %v196_v15  ;;  %v213_v19 = vld [vmem:[%s2343_s28 + $0xb0] sm:$0xff]  ;;  %v214_v22 = vld [vmem:[%s2343_s28 + $0xb8] sm:$0xff]  ;;  %v199_v24 = vld [vmem:[%s2343_s28 + $0x40] sm:$0xff] }
  0x37   : > { %v1777_v20 = vpack.i.bf16 %v213_v19, %v197_v18  ;;  %v1779_v23 = vpack.i.bf16 %v214_v22, %v198_v21  ;;  %v215_v25 = vld [vmem:[%s2343_s28 + $0xc0] sm:$0xff]  ;;  %v200_v27 = vld [vmem:[%s2343_s28 + $0x48] sm:$0xff]  ;;  %v201_v30 = vld [vmem:[%s2343_s28 + $0x50] sm:$0xff]  ;;  %s3154_s16 = smov (!%p186_p7, %s2276_s16), 1 }
  0x38   : > { %v1781_v26 = vpack.i.bf16 %v215_v25, %v199_v24  ;;  %v216_v28 = vld [vmem:[%s2343_s28 + $0xc8] sm:$0xff]  ;;  %v217_v31 = vld [vmem:[%s2343_s28 + $0xd0] sm:$0xff]  ;;  %v202_v33 = vld [vmem:[%s2343_s28 + $0x58] sm:$0xff]  ;;  %v3133_v24 = vmov 0.0   ;;  %v287_v25 = vlaneseq }
  0x39   : > { %1768 = vxpose.xlu0.b32.cont [2/16] (narrow) %v1767_v5, 64  ;;  %v1783_v29 = vpack.i.bf16 %v216_v28, %v200_v27  ;;  %v1785_v32 = vpack.i.bf16 %v217_v31, %v201_v30  ;;  %v218_v34 = vld [vmem:[%s2343_s28 + $0xd8] sm:$0xff]  ;;  %v203_v36 = vld [vmem:[%s2343_s28 + $0x60] sm:$0xff]  ;;  %v204_v39 = vld [vmem:[%s2343_s28 + $0x68] sm:$0xff]  ;;  %427 = vmatprep.mubr.f32.mxu0 %v3133_v24 }
  0x3a   : > { %v1787_v35 = vpack.i.bf16 %v218_v34, %v202_v33  ;;  %v219_v37 = vld [vmem:[%s2343_s28 + $0xe0] sm:$0xff]  ;;  %v220_v40 = vld [vmem:[%s2343_s28 + $0xe8] sm:$0xff]  ;;  %v205_v42 = vld [vmem:[%s2343_s28 + $0x70] sm:$0xff]  ;;  %562 = vmatprep.mubr.f32.mxu1 %v3133_v24  ;;  %v2481_v27 = vand.u32 127, %v287_v25 }
  0x3b   : > { %v1789_v38 = vpack.i.bf16 %v219_v37, %v203_v36  ;;  %v1791_v41 = vpack.i.bf16 %v220_v40, %v204_v39  ;;  %v221_v43 = vld [vmem:[%s2343_s28 + $0xf0] sm:$0xff]  ;;  %v206_v45 = vld [vmem:[%s2343_s28 + $0x78] sm:$0xff] }
  0x3c   : > { %v1793_v44 = vpack.i.bf16 %v221_v43, %v205_v42  ;;  %v222_v46 = vld [vmem:[%s2343_s28 + $0xf8] sm:$0xff]  ;;  %vm342_vm0 = vcmp.lt.s32.totalorder %v2481_v27, 17  ;;  %vm478_vm1 = vcmp.lt.s32.totalorder %v2481_v27, 16  ;;  %vm611_vm2 = vcmp.lt.s32.totalorder %v2481_v27, 15 }
  0x3d   : > { %1770 = vxpose.xlu0.b32.cont [3/16] (narrow) %v1769_v8, 64  ;;  %v1795_v47 = vpack.i.bf16 %v222_v46, %v206_v45  ;;  %vm746_vm3 = vcmp.lt.s32.totalorder %v2481_v27, 1  ;;  %vm957_vm4 = vcmp.lt.s32.totalorder %v2481_v27, 127  ;;  %vm1090_vm5 = vcmp.lt.s32.totalorder %v2481_v27, 113 }
  0x3e   : > { %vm1225_vm7 = vcmp.lt.s32.totalorder %v2481_v27, 112  ;;  %vm1358_vm8 = vcmp.lt.s32.totalorder %v2481_v27, 111 }
  0x41   : > { %1772 = vxpose.xlu0.b32.cont [4/16] (narrow) %v1771_v11, 64 }
  0x45   : > { %1774 = vxpose.xlu0.b32.cont [5/16] (narrow) %v1773_v14, 64 }
  0x49   : > { %1776 = vxpose.xlu0.b32.cont [6/16] (narrow) %v1775_v17, 64 }
  0x4d   : > { %1778 = vxpose.xlu0.b32.cont [7/16] (narrow) %v1777_v20, 64 }
  0x51   : > { %1780 = vxpose.xlu0.b32.cont [8/16] (narrow) %v1779_v23, 64 }
  0x55   : > { %1782 = vxpose.xlu0.b32.cont [9/16] (narrow) %v1781_v26, 64 }
  0x59   : > { %1784 = vxpose.xlu0.b32.cont [10/16] (narrow) %v1783_v29, 64 }
  0x5d   : > { %1786 = vxpose.xlu0.b32.cont [11/16] (narrow) %v1785_v32, 64 }
  0x61   : > { %1788 = vxpose.xlu0.b32.cont [12/16] (narrow) %v1787_v35, 64 }
  0x65   : > { %1790 = vxpose.xlu0.b32.cont [13/16] (narrow) %v1789_v38, 64 }
  0x69   : > { %1792 = vxpose.xlu0.b32.cont [14/16] (narrow) %v1791_v41, 64 }
  0x6d   : > { %1794 = vxpose.xlu0.b32.cont [15/16] (narrow) %v1793_v44, 64 }
  0x71   : > { %1796 = vxpose.xlu0.b32.end [16/16] (narrow) %v1795_v47, 64 }
  0xb5   : > { %v1797_v48 = vpop.trf.xlu0 }
  0xb6   : > { %v1798_v50 = vunpack.i.l.bf16 %v1797_v48  ;;  %v1801_v55 = vunpack.i.h.bf16 %v1797_v48 }
  0xb9   : > { %v1802_v49 = vpop.trf.xlu0 }
  0xba   : > { %v1803_v51 = vunpack.i.l.bf16 %v1802_v49  ;;  %v1806_v52 = vunpack.i.h.bf16 %v1802_v49 }
  0xbc   : > { %v1877_v53 = vpack.i.bf16 %v1803_v51, %v1798_v50  ;;  %v2383_v57 = vpack.i.bf16 %v1806_v52, %v1801_v55  ;;  %v2385_v59 = vpack.c.bf16 %v1806_v52, %v1801_v55  ;;  %v2387_v60 = vpack.c.bf16 %v1803_v51, %v1798_v50 }
  0xbd   : > { %v1807_v54 = vpop.trf.xlu0 }
  0xbe   : > { %1878 = vrot.lane.b32.xlu0 %v1877_v53, %s2227_s15  ;;  %1838 = vrot.lane.b32.xlu1 %v1877_v53, %s2228_s21  ;;  %v1808_v56 = vunpack.i.l.bf16 %v1807_v54  ;;  %v1811_v62 = vunpack.i.h.bf16 %v1807_v54 }
  0xc1   : > { %v1812_v58 = vpop.trf.xlu0 }
  0xc2   : > { %v1813_v61 = vunpack.i.l.bf16 %v1812_v58  ;;  %1888 = vrot.lane.b32.xlu0 %v1877_v53, %s2229_s27  ;;  %1843 = vrot.lane.b32.xlu1 %v2383_v57, %s2228_s21  ;;  %v1816_v63 = vunpack.i.h.bf16 %v1812_v58 }
  0xc4   : > { %v1937_v0 = vpack.i.bf16 %v1813_v61, %v1808_v56  ;;  %v2394_v3 = vpack.i.bf16 %v1816_v63, %v1811_v62  ;;  %v2396_v6 = vpack.c.bf16 %v1816_v63, %v1811_v62  ;;  %v2398_v7 = vpack.c.bf16 %v1813_v61, %v1808_v56 }
  0xc5   : > { %v1817_v1 = vpop.trf.xlu0 }
  0xc6   : > { %1938 = vrot.lane.b32.xlu0 %v1937_v0, %s2227_s15  ;;  %1848 = vrot.lane.b32.xlu1 %v1877_v53, %s2230_s29  ;;  %v1818_v2 = vunpack.i.l.bf16 %v1817_v1  ;;  %v1821_v4 = vunpack.i.h.bf16 %v1817_v1 }
  0xc9   : > { %v1822_v5 = vpop.trf.xlu0 }
  0xca   : > { %v1826_v8 = vunpack.i.h.bf16 %v1822_v5  ;;  %v1823_v9 = vunpack.i.l.bf16 %v1822_v5  ;;  %1948 = vrot.lane.b32.xlu0 %v1937_v0, %s2229_s27  ;;  %1853 = vrot.lane.b32.xlu1 %v2383_v57, %s2230_s29 }
  0xcc   : > { %v1967_v10 = vpack.i.bf16 %v1823_v9, %v1818_v2  ;;  %v2403_v12 = vpack.i.bf16 %v1826_v8, %v1821_v4  ;;  %v2407_v14 = vpack.c.bf16 %v1826_v8, %v1821_v4  ;;  %v2409_v15 = vpack.c.bf16 %v1823_v9, %v1818_v2 }
  0xcd   : > { %v1827_v11 = vpop.trf.xlu0 }
  0xce   : > { %1968 = vrot.lane.b32.xlu0 %v1967_v10, %s2230_s29  ;;  %1858 = vrot.lane.b32.xlu1 %v1877_v53, %s2231_s30  ;;  %v1828_v16 = vunpack.i.l.bf16 %v1827_v11  ;;  %v1831_v18 = vunpack.i.h.bf16 %v1827_v11 }
  0xd1   : > { %v1832_v13 = vpop.trf.xlu0 }
  0xd2   : > { %1988 = vrot.lane.b32.xlu0 %v1967_v10, %s2232_s4  ;;  %1863 = vrot.lane.b32.xlu1 %v2383_v57, %s2231_s30  ;;  %v1833_v17 = vunpack.i.l.bf16 %v1832_v13  ;;  %v1836_v19 = vunpack.i.h.bf16 %v1832_v13 }
  0xd4   : > { %v2414_v20 = vpack.i.bf16 %v1833_v17, %v1828_v16  ;;  %v2418_v21 = vpack.i.bf16 %v1836_v19, %v1831_v18  ;;  %v2420_v22 = vpack.c.bf16 %v1836_v19, %v1831_v18  ;;  %v2422_v23 = vpack.c.bf16 %v1833_v17, %v1828_v16 }
  0xd6   : > { %1998 = vrot.lane.b32.xlu0 %v1967_v10, %s2227_s15  ;;  %1868 = vrot.lane.b32.xlu1 %v1877_v53, %s2232_s4 }
  0xda   : > { %2008 = vrot.lane.b32.xlu0 %v1967_v10, %s2229_s27  ;;  %1873 = vrot.lane.b32.xlu1 %v2383_v57, %s2232_s4 }
  0xde   : > { %2048 = vrot.lane.b32.xlu0 %v1877_v53, %s2233_s5  ;;  %1883 = vrot.lane.b32.xlu1 %v2383_v57, %s2227_s15 }
  0xe2   : > { %2058 = vrot.lane.b32.xlu0 %v2414_v20, %s2232_s4  ;;  %1893 = vrot.lane.b32.xlu1 %v2383_v57, %s2229_s27 }
  0xe6   : > { %2063 = vrot.lane.b32.xlu0 %v1877_v53, %s2234_s6  ;;  %1898 = vrot.lane.b32.xlu1 %v1937_v0, %s2228_s21 }
  0xea   : > { %2078 = vrot.lane.b32.xlu0 %v1937_v0, %s2233_s5  ;;  %1903 = vrot.lane.b32.xlu1 %v2394_v3, %s2228_s21 }
  0xee   : > { %2088 = vrot.lane.b32.xlu0 %v1937_v0, %s2234_s6  ;;  %1908 = vrot.lane.b32.xlu1 %v1937_v0, %s2230_s29 }
  0xf2   : > { %1913 = vrot.lane.b32.xlu1 %v2394_v3, %s2230_s29  ;;  %2098 = vrot.lane.b32.xlu0 %v2414_v20, %s2227_s15 }
  0xf6   : > { %1918 = vrot.lane.b32.xlu1 %v1937_v0, %s2231_s30  ;;  %2108 = vrot.lane.b32.xlu0 %v2414_v20, %s2229_s27 }
  0xfa   : > { %1923 = vrot.lane.b32.xlu1 %v2394_v3, %s2231_s30  ;;  %2113 = vrot.lane.b32.xlu0 %v1967_v10, %s2233_s5 }
  0xfe   : > { %1928 = vrot.lane.b32.xlu1 %v1937_v0, %s2232_s4  ;;  %2128 = vrot.lane.b32.xlu0 %v1967_v10, %s2234_s6 }
 0x102   : > { %1933 = vrot.lane.b32.xlu1 %v2394_v3, %s2232_s4  ;;  %2138 = vrot.lane.b32.xlu0 %v2414_v20, %s2233_s5 }
 0x106   : > { %1943 = vrot.lane.b32.xlu1 %v2394_v3, %s2227_s15  ;;  %2148 = vrot.lane.b32.xlu0 %v2414_v20, %s2234_s6 }
 0x10a   : > { %1953 = vrot.lane.b32.xlu1 %v2394_v3, %s2229_s27 }
 0x10e   : > { %1958 = vrot.lane.b32.xlu1 %v1967_v10, %s2228_s21 }
 0x112   : > { %1963 = vrot.lane.b32.xlu1 %v2403_v12, %s2228_s21 }
 0x116   : > { %1973 = vrot.lane.b32.xlu1 %v2403_v12, %s2230_s29 }
 0x11a   : > { %1978 = vrot.lane.b32.xlu1 %v1967_v10, %s2231_s30 }
 0x11e   : > { %1983 = vrot.lane.b32.xlu1 %v2403_v12, %s2231_s30 }
 0x122   : > { %1993 = vrot.lane.b32.xlu1 %v2403_v12, %s2232_s4 }
 0x126   : > { %2003 = vrot.lane.b32.xlu1 %v2403_v12, %s2227_s15 }
 0x12a   : > { %2013 = vrot.lane.b32.xlu1 %v2414_v20, %s2228_s21 }
 0x12e   : > { %2018 = vrot.lane.b32.xlu1 %v2418_v21, %s2228_s21 }
 0x130   : > { %v1839_v26 = vpop.permute.xlu1 %1838  ;;  %v1879_v4 = vpop.permute.xlu0 %1878 }
 0x131   : > { %v1841_v29 = vunpack.i.h.bf16 %v1839_v26  ;;  %v1840_v30 = vunpack.i.l.bf16 %v1839_v26  ;;  %v1881_v25 = vunpack.i.h.bf16 %v1879_v4  ;;  %v1880_v26 = vunpack.i.l.bf16 %v1879_v4 }
 0x132   : > { %2023 = vrot.lane.b32.xlu1 %v2414_v20, %s2230_s29 }
 0x134   : > { %v1844_v28 = vpop.permute.xlu1 %1843 }
 0x135   : > { %v1846_v31 = vunpack.i.h.bf16 %v1844_v28  ;;  %v1845_v32 = vunpack.i.l.bf16 %v1844_v28 }
 0x136   : > { %2028 = vrot.lane.b32.xlu1 %v2418_v21, %s2230_s29 }
 0x137   : > { %v343_v33 = vsel %vm342_vm0, %v1840_v30, %v1845_v32  ;;  %v344_v34 = vsel %vm342_vm0, %v1841_v29, %v1846_v31  ;;  %v351_v35 = vsel %vm342_vm0, %v1845_v32, %v1840_v30  ;;  %v352_v36 = vsel %vm342_vm0, %v1846_v31, %v1841_v29  ;;  %v1889_v30 = vpop.permute.xlu0 %1888 }
 0x138   : > { %v1849_v37 = vpop.permute.xlu1 %1848  ;;  %v1570_v38 = vpack.c.bf16 %v344_v34, %v343_v33  ;;  %v1572_v39 = vpack.c.bf16 %v352_v36, %v351_v35 }
 0x139   : > { %v1851_v41 = vunpack.i.h.bf16 %v1849_v37  ;;  %v1850_v42 = vunpack.i.l.bf16 %v1849_v37 }
 0x13a   : > { %2033 = vrot.lane.b32.xlu1 %v2414_v20, %s2231_s30  ;;  %1571 = vmatprep.subr.bf16.mxu0 %v1570_v38  ;;  %v1891_v38 = vunpack.i.h.bf16 %v1889_v30 }
 0x13b   : > { %1573 = vmatpush1.bf16.msra.mxu0 %v1572_v39  ;;  %v1890_v39 = vunpack.i.l.bf16 %v1889_v30 }
 0x13c   : > { %v1854_v40 = vpop.permute.xlu1 %1853 }
 0x13d   : > { %v1856_v43 = vunpack.i.h.bf16 %v1854_v40  ;;  %v1855_v44 = vunpack.i.l.bf16 %v1854_v40 }
 0x13e   : > { %2038 = vrot.lane.b32.xlu1 %v2418_v21, %s2231_s30 }
 0x13f   : > { %v479_v45 = vsel %vm478_vm1, %v1850_v42, %v1855_v44  ;;  %v480_v46 = vsel %vm478_vm1, %v1851_v41, %v1856_v43  ;;  %v487_v47 = vsel %vm478_vm1, %v1855_v44, %v1850_v42  ;;  %v488_v48 = vsel %vm478_vm1, %v1856_v43, %v1851_v41 }
 0x140   : > { %v1859_v49 = vpop.permute.xlu1 %1858  ;;  %v1586_v50 = vpack.c.bf16 %v480_v46, %v479_v45  ;;  %v1588_v51 = vpack.c.bf16 %v488_v48, %v487_v47 }
 0x141   : > { %v1861_v53 = vunpack.i.h.bf16 %v1859_v49  ;;  %v1860_v54 = vunpack.i.l.bf16 %v1859_v49 }
 0x142   : > { %2043 = vrot.lane.b32.xlu1 %v2403_v12, %s2229_s27  ;;  %1587 = vmatprep.subr.bf16.mxu1 %v1586_v50 }
 0x143   : > { %1589 = vmatpush1.bf16.msra.mxu1 %v1588_v51 }
 0x144   : > { %v1864_v52 = vpop.permute.xlu1 %1863 }
 0x145   : > { %v1866_v55 = vunpack.i.h.bf16 %v1864_v52  ;;  %v1865_v56 = vunpack.i.l.bf16 %v1864_v52 }
 0x146   : > { %2053 = vrot.lane.b32.xlu1 %v2383_v57, %s2233_s5 }
 0x147   : > { %v2516_v58 = vsel %vm611_vm2, %v1865_v56, %v1860_v54  ;;  %v2520_v61 = vsel %vm611_vm2, %v1866_v55, %v1861_v53  ;;  %v2524_v62 = vsel %vm611_vm2, %v1860_v54, %v1865_v56  ;;  %v2528_v63 = vsel %vm611_vm2, %v1861_v53, %v1866_v55 }
 0x148   : > { %v1604_v0 = vpack.c.bf16 %v2520_v61, %v2516_v58  ;;  %v1869_v1 = vpop.permute.xlu1 %1868  ;;  %v1602_v2 = vpack.c.bf16 %v2528_v63, %v2524_v62 }
 0x149   : > { %v1871_v8 = vunpack.i.h.bf16 %v1869_v1  ;;  %v1870_v9 = vunpack.i.l.bf16 %v1869_v1 }
 0x14a   : > { %2068 = vrot.lane.b32.xlu1 %v2418_v21, %s2232_s4 }
 0x14c   : > { %v1874_v5 = vpop.permute.xlu1 %1873 }
 0x14d   : > { %v1876_v10 = vunpack.i.h.bf16 %v1874_v5  ;;  %v1875_v11 = vunpack.i.l.bf16 %v1874_v5 }
 0x14e   : > { %2073 = vrot.lane.b32.xlu1 %v2383_v57, %s2234_s6 }
 0x14f   : > { %v2541_v13 = vsel %vm746_vm3, %v1875_v11, %v1870_v9  ;;  %v2545_v16 = vsel %vm746_vm3, %v1876_v10, %v1871_v8  ;;  %v2549_v17 = vsel %vm746_vm3, %v1870_v9, %v1875_v11  ;;  %v2553_v18 = vsel %vm746_vm3, %v1871_v8, %v1876_v10 }
 0x150   : > { %v1884_v57 = vpop.permute.xlu1 %1883 }
 0x151   : > { %v1886_v28 = vunpack.i.h.bf16 %v1884_v57  ;;  %v1885_v29 = vunpack.i.l.bf16 %v1884_v57 }
 0x152   : > { %2083 = vrot.lane.b32.xlu1 %v2394_v3, %s2233_s5 }
 0x153   : > { %v2564_v31 = vsel %vm957_vm4, %v1881_v25, %v1886_v28  ;;  %v2568_v32 = vsel %vm957_vm4, %v1880_v26, %v1885_v29  ;;  %v2572_v33 = vsel %vm957_vm4, %v1885_v29, %v1880_v26  ;;  %v2576_v34 = vsel %vm957_vm4, %v1886_v28, %v1881_v25 }
 0x154   : > { %v1894_v36 = vpop.permute.xlu1 %1893 }
 0x155   : > { %v1896_v40 = vunpack.i.h.bf16 %v1894_v36  ;;  %v1895_v41 = vunpack.i.l.bf16 %v1894_v36 }
 0x156   : > { %2093 = vrot.lane.b32.xlu1 %v2394_v3, %s2234_s6 }
 0x157   : > { %v2587_v42 = vsel %vm1090_vm5, %v1891_v38, %v1896_v40  ;;  %v2591_v43 = vsel %vm1090_vm5, %v1890_v39, %v1895_v41  ;;  %v2595_v44 = vsel %vm1090_vm5, %v1895_v41, %v1890_v39  ;;  %v2599_v45 = vsel %vm1090_vm5, %v1896_v40, %v1891_v38 }
 0x158   : > { %v1899_v3 = vpop.permute.xlu1 %1898  ;;  %v2236_v40 = vmov 0  }
 0x159   : > { %v1901_v49 = vunpack.i.h.bf16 %v1899_v3  ;;  %v1900_v50 = vunpack.i.l.bf16 %v1899_v3  ;;  %2157 = vset.pattern.permute.xlu0 %v2236_v40 }
 0x15a   : > { %2103 = vrot.lane.b32.xlu1 %v2418_v21, %s2227_s15 }
 0x15c   : > { %v1904_v48 = vpop.permute.xlu1 %1903 }
 0x15d   : > { %v1906_v51 = vunpack.i.h.bf16 %v1904_v48  ;;  %v1905_v52 = vunpack.i.l.bf16 %v1904_v48  ;;  %v1939_v48 = vpop.permute.xlu0 %1938 }
 0x15e   : > { %2118 = vrot.lane.b32.xlu1 %v2418_v21, %s2229_s27 }
 0x15f   : > { %v345_v53 = vsel %vm342_vm0, %v1900_v50, %v1905_v52  ;;  %v346_v54 = vsel %vm342_vm0, %v1901_v49, %v1906_v51  ;;  %v353_v55 = vsel %vm342_vm0, %v1905_v52, %v1900_v50  ;;  %v354_v56 = vsel %vm342_vm0, %v1906_v51, %v1901_v49 }
 0x160   : > { %v1909_v1 = vpop.permute.xlu1 %1908  ;;  %v1574_v4 = vpack.c.bf16 %v346_v54, %v345_v53  ;;  %v1576_v5 = vpack.c.bf16 %v354_v56, %v353_v55  ;;  %v1941_v50 = vunpack.i.h.bf16 %v1939_v48  ;;  %v1940_v51 = vunpack.i.l.bf16 %v1939_v48 }
 0x161   : > { %v1911_v9 = vunpack.i.h.bf16 %v1909_v1  ;;  %v1910_v10 = vunpack.i.l.bf16 %v1909_v1  ;;  %v1949_v1 = vpop.permute.xlu0 %1948 }
 0x162   : > { %2123 = vrot.lane.b32.xlu1 %v2403_v12, %s2233_s5  ;;  %1575 = vmatprep.subr.bf16.mxu0 %v1574_v4 }
 0x163   : > { %1577 = vmatpush1.bf16.msra.mxu0 %v1576_v5 }
 0x164   : > { %v1914_v8 = vpop.permute.xlu1 %1913 }
 0x165   : > { %v1916_v11 = vunpack.i.h.bf16 %v1914_v8  ;;  %v1915_v57 = vunpack.i.l.bf16 %v1914_v8 }
 0x166   : > { %2133 = vrot.lane.b32.xlu1 %v2403_v12, %s2234_s6  ;;  %v1459_v12 = vld [vmem:[%s3131_s2] sm:$0x7] }
 0x167   : > { %v481_v25 = vsel %vm478_vm1, %v1910_v10, %v1915_v57  ;;  %v482_v26 = vsel %vm478_vm1, %v1911_v9, %v1916_v11  ;;  %v489_v28 = vsel %vm478_vm1, %v1915_v57, %v1910_v10  ;;  %v490_v29 = vsel %vm478_vm1, %v1916_v11, %v1911_v9  ;;  %1462 = vperm.xlu0 %2157, %v1459_v12  }
 0x168   : > { %v2629_v30 = vpop.permute.xlu1 %1918  ;;  %v1590_v36 = vpack.c.bf16 %v482_v26, %v481_v25  ;;  %v1592_v38 = vpack.c.bf16 %v490_v29, %v489_v28  ;;  %v1951_v9 = vunpack.i.h.bf16 %v1949_v1  ;;  %v1950_v10 = vunpack.i.l.bf16 %v1949_v1 }
 0x16a   : > { %2143 = vrot.lane.b32.xlu1 %v2418_v21, %s2233_s5  ;;  %1591 = vmatprep.subr.bf16.mxu1 %v1590_v36  ;;  %s1569_s5 = sshll.u32 %s3154_s16, 3 }
 0x16b   : > { %1593 = vmatpush1.bf16.msra.mxu1 %v1592_v38  ;;  %s190_s8 = scalar_lea.vmem %s3132_s3, %s1569_s5 }
 0x16c   : > { %v2636_v39 = vpop.permute.xlu1 %1923 }
 0x16e   : > { %2153 = vrot.lane.b32.xlu1 %v2418_v21, %s2234_s6 }
 0x170   : > { %v2640_v41 = vpop.permute.xlu1 %1928 }
 0x171   : > { %v1931_v58 = vunpack.i.h.bf16 %v2640_v41  ;;  %v1930_v61 = vunpack.i.l.bf16 %v2640_v41  ;;  %v1550_v41 = vld [vmem:[%s3130_s1 + $0x4] sm:$0x7] }
 0x174   : > { %v2642_v3 = vpop.permute.xlu1 %1933 }
 0x178   : > { %v1944_v49 = vpop.permute.xlu1 %1943 }
 0x179   : > { %v1946_v52 = vunpack.i.h.bf16 %v1944_v49  ;;  %v1945_v53 = vunpack.i.l.bf16 %v1944_v49 }
 0x17b   : > { %v2646_v54 = vsel %vm957_vm4, %v1941_v50, %v1946_v52  ;;  %v2650_v55 = vsel %vm957_vm4, %v1940_v51, %v1945_v53  ;;  %v2654_v21 = vsel %vm957_vm4, %v1945_v53, %v1940_v51  ;;  %v2658_v56 = vsel %vm957_vm4, %v1946_v52, %v1941_v50 }
 0x17c   : > { %v1954_v5 = vpop.permute.xlu1 %1953 }
 0x17d   : > { %v1956_v11 = vunpack.i.h.bf16 %v1954_v5  ;;  %v1955_v57 = vunpack.i.l.bf16 %v1954_v5 }
 0x17f   : > { %v2666_v25 = vsel %vm1090_vm5, %v1951_v9, %v1956_v11  ;;  %v2670_v26 = vsel %vm1090_vm5, %v1950_v10, %v1955_v57  ;;  %v2674_v28 = vsel %vm1090_vm5, %v1955_v57, %v1950_v10  ;;  %v2678_v29 = vsel %vm1090_vm5, %v1956_v11, %v1951_v9  ;;  %v1969_v9 = vpop.permute.xlu0 %1968 }
 0x180   : > { %v1959_v38 = vpop.permute.xlu1 %1958  ;;  %v1971_v36 = vunpack.i.h.bf16 %v1969_v9 }
 0x181   : > { %v1961_v48 = vunpack.i.h.bf16 %v1959_v38  ;;  %v1960_v49 = vunpack.i.l.bf16 %v1959_v38  ;;  %v1970_v38 = vunpack.i.l.bf16 %v1969_v9 }
 0x184   : > { %v1964_v40 = vpop.permute.xlu1 %1963 }
 0x185   : > { %v1966_v50 = vunpack.i.h.bf16 %v1964_v40  ;;  %v1965_v51 = vunpack.i.l.bf16 %v1964_v40 }
 0x187   : > { %v347_v52 = vsel %vm342_vm0, %v1960_v49, %v1965_v51  ;;  %v348_v53 = vsel %vm342_vm0, %v1961_v48, %v1966_v50  ;;  %v355_v1 = vsel %vm342_vm0, %v1965_v51, %v1960_v49  ;;  %v356_v5 = vsel %vm342_vm0, %v1966_v50, %v1961_v48 }
 0x188   : > { %v1974_v10 = vpop.permute.xlu1 %1973  ;;  %v1578_v11 = vpack.c.bf16 %v348_v53, %v347_v52  ;;  %v1580_v57 = vpack.c.bf16 %v356_v5, %v355_v1  ;;  %v2704_v1 = vpop.permute.xlu0 %1988 }
 0x189   : > { %v1976_v12 = vunpack.i.h.bf16 %v1974_v10  ;;  %v1975_v40 = vunpack.i.l.bf16 %v1974_v10 }
 0x18a   : > { %1579 = vmatprep.subr.bf16.mxu0 %v1578_v11 }
 0x18b   : > { %1581 = vmatpush1.bf16.msra.mxu0 %v1580_v57  ;;  %v483_v46 = vsel %vm478_vm1, %v1970_v38, %v1975_v40  ;;  %v484_v4 = vsel %vm478_vm1, %v1971_v36, %v1976_v12  ;;  %v491_v49 = vsel %vm478_vm1, %v1975_v40, %v1970_v38  ;;  %v492_v48 = vsel %vm478_vm1, %v1976_v12, %v1971_v36 }
 0x18c   : > { %v2700_v50 = vpop.permute.xlu1 %1978  ;;  %v1594_v51 = vpack.c.bf16 %v484_v4, %v483_v46  ;;  %v1596_v52 = vpack.c.bf16 %v492_v48, %v491_v49  ;;  %v2708_v9 = vpop.permute.xlu0 %1998  ;;  %v1926_v36 = vunpack.i.h.bf16 %v2636_v39  ;;  %v1925_v46 = vunpack.i.l.bf16 %v2636_v39 }
 0x18d   : > { %v1921_v48 = vunpack.i.h.bf16 %v2629_v30 }
 0x18e   : > { %1595 = vmatprep.subr.bf16.mxu1 %v1594_v51  ;;  %v1920_v51 = vunpack.i.l.bf16 %v2629_v30 }
 0x18f   : > { %1597 = vmatpush1.bf16.msra.mxu1 %v1596_v52  ;;  %v615_v19 = vsel %vm611_vm2, %v1921_v48, %v1926_v36 }
 0x190   : > { %v2702_v53 = vpop.permute.xlu1 %1983  ;;  %v2712_v57 = vpop.permute.xlu0 %2008  ;;  %v614_v30 = vsel %vm611_vm2, %v1920_v51, %v1925_v46 }
 0x191   : > { %v1986_v20 = vunpack.i.h.bf16 %v2702_v53  ;;  %v1985_v24 = vunpack.i.l.bf16 %v2702_v53  ;;  %v1606_v53 = vpack.c.bf16 %v615_v19, %v614_v30 }
 0x194   : > { %v2706_v5 = vpop.permute.xlu1 %1993  ;;  %v2718_v52 = vpop.permute.xlu0 %2048 }
 0x198   : > { %v2710_v10 = vpop.permute.xlu1 %2003 }
 0x19c   : > { %v2014_v11 = vpop.permute.xlu1 %2013 }
 0x19d   : > { %v2016_v12 = vunpack.i.h.bf16 %v2014_v11  ;;  %v2015_v38 = vunpack.i.l.bf16 %v2014_v11 }
 0x1a0   : > { %v2019_v4 = vpop.permute.xlu1 %2018 }
 0x1a1   : > { %v2021_v40 = vunpack.i.h.bf16 %v2019_v4  ;;  %v2020_v49 = vunpack.i.l.bf16 %v2019_v4 }
 0x1a3   : > { %v349_v47 = vsel %vm342_vm0, %v2015_v38, %v2020_v49  ;;  %v350_v8 = vsel %vm342_vm0, %v2016_v12, %v2021_v40  ;;  %v357_v39 = vsel %vm342_vm0, %v2020_v49, %v2015_v38  ;;  %v358_v11 = vsel %vm342_vm0, %v2021_v40, %v2016_v12 }
 0x1a4   : > { %v2024_v35 = vpop.permute.xlu1 %2023  ;;  %v1582_v4 = vpack.c.bf16 %v350_v8, %v349_v47  ;;  %v1584_v37 = vpack.c.bf16 %v358_v11, %v357_v39  ;;  %v622_v38 = vsel %vm611_vm2, %v1925_v46, %v1920_v51  ;;  %v309_v47 = vld [vmem:[%s3130_s1] sm:$0x7]  ;;  %v623_v8 = vsel %vm611_vm2, %v1926_v36, %v1921_v48  ;;  %v2746_v46 = vpop.permute.xlu0 %2058 }
 0x1a5   : > { %v1981_v12 = vunpack.i.h.bf16 %v2700_v50  ;;  %v1980_v40 = vunpack.i.l.bf16 %v2700_v50  ;;  %v2025_v51 = vunpack.i.l.bf16 %v2024_v35  ;;  %v1935_v36 = vunpack.i.l.bf16 %v2642_v3 }
 0x1a6   : > { %1583 = vmatprep.subr.bf16.mxu0 %v1582_v4  ;;  %v1936_v4 = vunpack.i.h.bf16 %v2642_v3  ;;  %v1608_v3 = vpack.c.bf16 %v623_v8, %v622_v38  ;;  %v1995_v38 = vunpack.i.l.bf16 %v2706_v5 }
 0x1a7   : > { %1585 = vmatpush1.bf16.msra.mxu0 %v1584_v37  ;;  %v2026_v37 = vunpack.i.h.bf16 %v2024_v35  ;;  %v616_v50 = vsel %vm611_vm2, %v1980_v40, %v1985_v24  ;;  %v617_v62 = vsel %vm611_vm2, %v1981_v12, %v1986_v20 }
 0x1a8   : > { %v2029_v49 = vpop.permute.xlu1 %2028  ;;  %1603 = vmatprep.subr.bf16.mxu0 %v1602_v2  ;;  %v1610_v8 = vpack.c.bf16 %v617_v62, %v616_v50  ;;  %v3139_v50 = vpack.c.bf16 %v2553_v18, %v2549_v17 }
 0x1a9   : > { %v2031_v39 = vunpack.i.h.bf16 %v2029_v49  ;;  %v2030_v11 = vunpack.i.l.bf16 %v2029_v49  ;;  %v3138_v49 = vmov 0.0  }
 0x1aa   : > { %1549 = vmatmul.mubr.msk.f32.vlgmr.msra.gmra.mrb[0].mxu0 %vm359_vm6, %v309_v47 }
 0x1ab   : > { %1605 = vmatpush1.bf16.msra.mxu0 %v1604_v0  ;;  %v485_v63 = vsel %vm478_vm1, %v2025_v51, %v2030_v11  ;;  %v486_v2 = vsel %vm478_vm1, %v2026_v37, %v2031_v39  ;;  %v493_v19 = vsel %vm478_vm1, %v2030_v11, %v2025_v51  ;;  %v494_v35 = vsel %vm478_vm1, %v2031_v39, %v2026_v37 }
 0x1ac   : > { %v2034_v48 = vpop.permute.xlu1 %2033  ;;  %1607 = vmatprep.subr.bf16.mxu0 %v1606_v53  ;;  %v1598_v30 = vpack.c.bf16 %v486_v2, %v485_v63  ;;  %v1600_v47 = vpack.c.bf16 %v494_v35, %v493_v19  ;;  %695 = vmatprep.mubr.f32.mxu0 %v3138_v49  ;;  %v624_v0 = vsel %vm611_vm2, %v1985_v24, %v1980_v40  ;;  %v1996_v11 = vunpack.i.h.bf16 %v2706_v5  ;;  %v2775_v53 = vpop.permute.xlu0 %2063 }
 0x1ad   : > { %v625_v51 = vsel %vm611_vm2, %v1986_v20, %v1981_v12  ;;  %v749_v24 = vsel %vm746_vm3, %v1930_v61, %v1935_v36  ;;  %v750_v20 = vsel %vm746_vm3, %v1931_v58, %v1936_v4  ;;  %v1991_v12 = vunpack.i.h.bf16 %v2704_v1 }
 0x1ae   : > { %1599 = vmatprep.subr.bf16.mxu1 %v1598_v30  ;;  %v1990_v5 = vunpack.i.l.bf16 %v2704_v1  ;;  %v757_v40 = vsel %vm746_vm3, %v1935_v36, %v1930_v61  ;;  %v1612_v37 = vpack.c.bf16 %v625_v51, %v624_v0  ;;  %v2036_v62 = vunpack.i.h.bf16 %v2034_v48 }
 0x1af   : > { %1601 = vmatpush1.bf16.msra.mxu1 %v1600_v47  ;;  %1609 = vmatpush1.bf16.msra.mxu0 %v1608_v3  ;;  %v2035_v63 = vunpack.i.l.bf16 %v2034_v48  ;;  %v758_v35 = vsel %vm746_vm3, %v1936_v4, %v1931_v58  ;;  %v1622_v1 = vpack.c.bf16 %v750_v20, %v749_v24  ;;  %v752_v3 = vsel %vm746_vm3, %v1991_v12, %v1996_v11  ;;  %v1552_v24 = vld [vmem:[%s3130_s1 + $0x8] sm:$0x7] }
 0x1b0   : > { %v2039_v39 = vpop.permute.xlu1 %2038  ;;  %1611 = vmatprep.subr.bf16.mxu0 %v1610_v8  ;;  %1619 = vmatprep.subr.bf16.mxu1 %v3139_v50  ;;  %v751_v36 = vsel %vm746_vm3, %v1990_v5, %v1995_v38  ;;  %v3140_v48 = vpack.c.bf16 %v2545_v16, %v2541_v13  ;;  %v2812_v61 = vpop.permute.xlu0 %2078  ;;  %v1624_v0 = vpack.c.bf16 %v758_v35, %v757_v40  ;;  %v1554_v35 = vld [vmem:[%s3130_s1 + $0xc] sm:$0x7] }
 0x1b1   : > { %v2041_v2 = vunpack.i.h.bf16 %v2039_v39  ;;  %v2040_v19 = vunpack.i.l.bf16 %v2039_v39  ;;  %v760_v13 = vsel %vm746_vm3, %v1996_v11, %v1991_v12  ;;  %v759_v16 = vsel %vm746_vm3, %v1995_v38, %v1990_v5 }
 0x1b2   : > { %1551 = vmatmul.mubr.msk.f32.vlgmr.msra.gmra.mrb[0].mxu1 %vm359_vm6, %v1550_v41  ;;  %v1626_v8 = vpack.c.bf16 %v752_v3, %v751_v36  ;;  %v1628_v20 = vpack.c.bf16 %v760_v13, %v759_v16  ;;  %v2061_v38 = vunpack.i.h.bf16 %v2746_v46  ;;  %v2060_v12 = vunpack.i.l.bf16 %v2746_v46 }
 0x1b3   : > { %v626_v17 = vsel %vm611_vm2, %v2040_v19, %v2035_v63  ;;  %v627_v18 = vsel %vm611_vm2, %v2041_v2, %v2036_v62  ;;  %1613 = vmatpush1.bf16.msra.mxu0 %v1612_v37  ;;  %1621 = vmatpush1.bf16.msra.mxu1 %v3140_v48  ;;  %v618_v4 = vsel %vm611_vm2, %v2035_v63, %v2040_v19  ;;  %v2005_v19 = vunpack.i.l.bf16 %v2710_v10 }
 0x1b4   : > { %v1616_v30 = vpack.c.bf16 %v627_v18, %v626_v17  ;;  %v2807_v47 = vpop.permute.xlu1 %2043  ;;  %1623 = vmatprep.subr.bf16.mxu1 %v1622_v1  ;;  %v619_v58 = vsel %vm611_vm2, %v2036_v62, %v2041_v2  ;;  %830 = vmatprep.mubr.f32.mxu1 %v3138_v49  ;;  %v2824_v40 = vpop.permute.xlu0 %2088  ;;  %v2006_v2 = vunpack.i.h.bf16 %v2710_v10  ;;  %v2001_v1 = vunpack.i.h.bf16 %v2708_v9 }
 0x1b5   : > { %v1614_v51 = vpack.c.bf16 %v619_v58, %v618_v4  ;;  %v2000_v36 = vunpack.i.l.bf16 %v2708_v9  ;;  %v2011_v10 = vunpack.i.h.bf16 %v2712_v57  ;;  %v2046_v17 = vunpack.i.h.bf16 %v2807_v47 }
 0x1b6   : > { %v2045_v18 = vunpack.i.l.bf16 %v2807_v47  ;;  %v2051_v48 = vunpack.i.h.bf16 %v2718_v52  ;;  %v2050_v4 = vunpack.i.l.bf16 %v2718_v52  ;;  %v2081_v9 = vunpack.i.h.bf16 %v2812_v61 }
 0x1b7   : > { %1615 = vmatprep.subr.bf16.mxu0 %v1614_v51  ;;  %1625 = vmatpush1.bf16.msra.mxu1 %v1624_v0  ;;  %v963_v52 = vsel %vm957_vm4, %v2001_v1, %v2006_v2  ;;  %v962_v47 = vsel %vm957_vm4, %v2000_v36, %v2005_v19  ;;  %v1556_v51 = vld [vmem:[%s3130_s1 + $0x10] sm:$0x7]  ;;  %v2080_v13 = vunpack.i.l.bf16 %v2812_v61  ;;  %v2091_v16 = vunpack.i.h.bf16 %v2824_v40 }
 0x1b8   : > { %1617 = vmatpush1.bf16.msra.mxu0 %v1616_v30  ;;  %v2818_v41 = vpop.permute.xlu1 %2053  ;;  %1627 = vmatprep.subr.bf16.mxu1 %v1626_v8  ;;  %v2832_v39 = vpop.permute.xlu0 %2098  ;;  %v3142_v30 = vpack.c.bf16 %v2564_v31, %v2568_v32  ;;  %v3143_v32 = vpack.c.bf16 %v2658_v56, %v2654_v21  ;;  %v3144_v8 = vpack.c.bf16 %v2599_v45, %v2595_v44 }
 0x1b9   : > { %1635 = vmatprep.subr.bf16.mxu0 %v2385_v59  ;;  %v2056_v58 = vunpack.i.h.bf16 %v2818_v41  ;;  %v2055_v0 = vunpack.i.l.bf16 %v2818_v41  ;;  %v1104_v41 = vsel %vm1090_vm5, %v2046_v17, %v2011_v10  ;;  %v2101_v21 = vunpack.i.h.bf16 %v2832_v39 }
 0x1ba   : > { %v2100_v56 = vunpack.i.l.bf16 %v2832_v39  ;;  %v1096_v44 = vsel %vm1090_vm5, %v2011_v10, %v2046_v17 }
 0x1bb   : > { %1553 = vmatmul.mubr.msk.f32.vlgmr.msra.gmra.mrb[2].mxu0 %vm359_vm6, %v1552_v24  ;;  %1629 = vmatpush1.bf16.msra.mxu1 %v1628_v20  ;;  %v1227_v39 = vsel %vm1225_vm7, %v2051_v48, %v2056_v58 }
 0x1bc   : > { %1637 = vmatpush1.bf16.msra.mxu0 %v2387_v60  ;;  %v2069_v11 = vpop.permute.xlu1 %2068  ;;  %914 = vmatprep.mubr.f32.mxu0 %v3138_v49  ;;  %v2861_v3 = vpop.permute.xlu0 %2108 }
 0x1bd   : > { %v2071_v5 = vunpack.i.h.bf16 %v2069_v11  ;;  %v2070_v37 = vunpack.i.l.bf16 %v2069_v11  ;;  %1639 = vmatprep.subr.bf16.mxu0 %v2396_v6  ;;  %v2111_v24 = vunpack.i.h.bf16 %v2861_v3  ;;  %v2110_v11 = vunpack.i.l.bf16 %v2861_v3 }
 0x1bf   : > { %v762_v59 = vsel %vm746_vm3, %v2071_v5, %v2061_v38  ;;  %v761_v50 = vsel %vm746_vm3, %v2070_v37, %v2060_v12  ;;  %v753_v60 = vsel %vm746_vm3, %v2060_v12, %v2070_v37  ;;  %v754_v62 = vsel %vm746_vm3, %v2061_v38, %v2071_v5 }
 0x1c0   : > { %v1632_v63 = vpack.c.bf16 %v762_v59, %v761_v50  ;;  %1641 = vmatpush1.bf16.msra.mxu0 %v2398_v7  ;;  %v2843_v46 = vpop.permute.xlu1 %2073  ;;  %v1630_v6 = vpack.c.bf16 %v754_v62, %v753_v60  ;;  %v2910_v38 = vpop.permute.xlu0 %2113  ;;  %v1660_v12 = vpack.c.bf16 %v963_v52, %v962_v47  ;;  %v3145_v5 = vpack.c.bf16 %v2646_v54, %v2650_v55  ;;  %v1558_v47 = vld [vmem:[%s3130_s1 + $0x14] sm:$0x7] }
 0x1c1   : > { %1643 = vmatprep.subr.bf16.mxu0 %v2407_v14  ;;  %v3141_v14 = vpack.c.bf16 %v2576_v34, %v2572_v33  ;;  %v2066_v33 = vunpack.i.h.bf16 %v2775_v53  ;;  %v2065_v34 = vunpack.i.l.bf16 %v2775_v53  ;;  %v2116_v37 = vunpack.i.h.bf16 %v2910_v38 }
 0x1c2   : > { %1631 = vmatprep.subr.bf16.mxu1 %v1630_v6  ;;  %v1226_v59 = vsel %vm1225_vm7, %v2050_v4, %v2055_v0  ;;  %v3146_v50 = vpack.c.bf16 %v2587_v42, %v2591_v43  ;;  %v3147_v54 = vpack.c.bf16 %v2678_v29, %v2674_v28  ;;  %v1234_v55 = vsel %vm1225_vm7, %v2055_v0, %v2050_v4 }
 0x1c3   : > { %1633 = vmatpush1.bf16.msra.mxu1 %v1632_v63  ;;  %v2076_v42 = vunpack.i.h.bf16 %v2843_v46  ;;  %v2075_v43 = vunpack.i.l.bf16 %v2843_v46 }
 0x1c4   : > { %1645 = vmatpush1.bf16.msra.mxu0 %v2409_v15  ;;  %v2854_v7 = vpop.permute.xlu1 %2083  ;;  %1651 = vmatprep.subr.bf16.mxu1 %v3141_v14  ;;  %v2010_v15 = vunpack.i.l.bf16 %v2712_v57  ;;  %v971_v57 = vsel %vm957_vm4, %v2006_v2, %v2001_v1  ;;  %v1235_v2 = vsel %vm1225_vm7, %v2056_v58, %v2051_v48 }
 0x1c5   : > { %1647 = vmatprep.subr.bf16.mxu0 %v2420_v22  ;;  %v970_v22 = vsel %vm957_vm4, %v2005_v19, %v2000_v36  ;;  %v2086_v19 = vunpack.i.h.bf16 %v2854_v7  ;;  %v2115_v36 = vunpack.i.l.bf16 %v2910_v38  ;;  %v1682_v4 = vpack.c.bf16 %v1235_v2, %v1234_v55 }
 0x1c6   : > { %1555 = vmatmul.mubr.msk.f32.vlgmr.msra.gmra.mrb[2].mxu1 %vm359_vm6, %v1554_v35  ;;  %v1658_v20 = vpack.c.bf16 %v971_v57, %v970_v22  ;;  %v1095_v45 = vsel %vm1090_vm5, %v2010_v15, %v2045_v18  ;;  %v2085_v35 = vunpack.i.l.bf16 %v2854_v7  ;;  %v3148_v7 = vpack.c.bf16 %v2666_v25, %v2670_v26 }
 0x1c7   : > { %1653 = vmatpush1.bf16.msra.mxu1 %v3142_v30  ;;  %1041 = vmatprep.mubr.f32.mxu1 %v3138_v49  ;;  %v1676_v46 = vpack.c.bf16 %v1096_v44, %v1095_v45  ;;  %v1237_v22 = vsel %vm1225_vm7, %v2086_v19, %v2081_v9  ;;  %v1367_v25 = vsel %vm1358_vm8, %v2075_v43, %v2065_v34 }
 0x1c8   : > { %1649 = vmatpush1.bf16.msra.mxu0 %v2422_v23  ;;  %v2889_v31 = vpop.permute.xlu1 %2093  ;;  %1655 = vmatprep.subr.bf16.mxu1 %v3143_v32  ;;  %v1103_v23 = vsel %vm1090_vm5, %v2045_v18, %v2010_v15  ;;  %v1684_v18 = vpack.c.bf16 %v1227_v39, %v1226_v59  ;;  %v1236_v30 = vsel %vm1225_vm7, %v2085_v35, %v2080_v13  ;;  %v2129_v32 = vpop.permute.xlu0 %2128 }
 0x1c9   : > { %1667 = vmatprep.subr.bf16.mxu0 %v3144_v8  ;;  %v1674_v62 = vpack.c.bf16 %v1104_v41, %v1103_v23  ;;  %v1368_v26 = vsel %vm1358_vm8, %v2076_v42, %v2066_v33  ;;  %v2095_v8 = vunpack.i.l.bf16 %v2889_v31  ;;  %v1228_v44 = vsel %vm1225_vm7, %v2080_v13, %v2085_v35  ;;  %v1560_v13 = vld [vmem:[%s3130_s1 + $0x18] sm:$0x7] }
 0x1ca   : > { %v1686_v53 = vpack.c.bf16 %v1237_v22, %v1236_v30 }
 0x1cb   : > { %1557 = vmatmul.mubr.msk.f32.vlgmr.msra.gmra.mrb[4].mxu0 %vm359_vm6, %v1556_v51  ;;  %1657 = vmatpush1.bf16.msra.mxu1 %v3145_v5  ;;  %v2096_v51 = vunpack.i.h.bf16 %v2889_v31  ;;  %v1229_v31 = vsel %vm1225_vm7, %v2081_v9, %v2086_v19  ;;  %v2131_v9 = vunpack.i.h.bf16 %v2129_v32  ;;  %v2130_v5 = vunpack.i.l.bf16 %v2129_v32 }
 0x1cc   : > { %1669 = vmatpush1.bf16.msra.mxu0 %v3146_v50  ;;  %v2104_v60 = vpop.permute.xlu1 %2103  ;;  %1659 = vmatprep.subr.bf16.mxu1 %v1658_v20  ;;  %v2139_v61 = vpop.permute.xlu0 %2138 }
 0x1cd   : > { %v2106_v63 = vunpack.i.h.bf16 %v2104_v60  ;;  %v2105_v6 = vunpack.i.l.bf16 %v2104_v60  ;;  %1671 = vmatprep.subr.bf16.mxu0 %v3147_v54  ;;  %1174 = vmatprep.mubr.f32.mxu0 %v3138_v49  ;;  %v1370_v50 = vsel %vm1358_vm8, %v2096_v51, %v2091_v16  ;;  %v1362_v54 = vsel %vm1358_vm8, %v2091_v16, %v2096_v51 }
 0x1ce   : > { %v2141_v16 = vunpack.i.h.bf16 %v2139_v61  ;;  %v2140_v35 = vunpack.i.l.bf16 %v2139_v61 }
 0x1cf   : > { %v965_v28 = vsel %vm957_vm4, %v2101_v21, %v2106_v63  ;;  %v964_v29 = vsel %vm957_vm4, %v2100_v56, %v2105_v6  ;;  %1661 = vmatpush1.bf16.msra.mxu1 %v1660_v12  ;;  %v972_v1 = vsel %vm957_vm4, %v2105_v6, %v2100_v56  ;;  %v973_v14 = vsel %vm957_vm4, %v2106_v63, %v2101_v21 }
 0x1d0   : > { %v1664_v10 = vpack.c.bf16 %v965_v28, %v964_v29  ;;  %1673 = vmatpush1.bf16.msra.mxu0 %v3148_v7  ;;  %v2119_v3 = vpop.permute.xlu1 %2118  ;;  %v1662_v17 = vpack.c.bf16 %v973_v14, %v972_v1  ;;  %v1360_v56 = vsel %vm1358_vm8, %v2066_v33, %v2076_v42  ;;  %v2090_v12 = vunpack.i.l.bf16 %v2824_v40  ;;  %v2149_v14 = vpop.permute.xlu0 %2148 }
 0x1d1   : > { %v2121_v15 = vunpack.i.h.bf16 %v2119_v3  ;;  %v2120_v48 = vunpack.i.l.bf16 %v2119_v3  ;;  %1675 = vmatprep.subr.bf16.mxu0 %v1674_v62  ;;  %v1698_v33 = vpack.c.bf16 %v1368_v26, %v1367_v25  ;;  %v1688_v62 = vpack.c.bf16 %v1229_v31, %v1228_v44 }
 0x1d2   : > { %1663 = vmatprep.subr.bf16.mxu1 %v1662_v17  ;;  %v1369_v59 = vsel %vm1358_vm8, %v2095_v8, %v2090_v12  ;;  %v2151_v30 = vunpack.i.h.bf16 %v2149_v14  ;;  %v2150_v22 = vunpack.i.l.bf16 %v2149_v14 }
 0x1d3   : > { %v1098_v57 = vsel %vm1090_vm5, %v2111_v24, %v2121_v15  ;;  %v1097_v52 = vsel %vm1090_vm5, %v2110_v11, %v2120_v48  ;;  %1665 = vmatpush1.bf16.msra.mxu1 %v1664_v10  ;;  %v1105_v58 = vsel %vm1090_vm5, %v2120_v48, %v2110_v11  ;;  %v1106_v0 = vsel %vm1090_vm5, %v2121_v15, %v2111_v24 }
 0x1d4   : > { %v1680_v23 = vpack.c.bf16 %v1098_v57, %v1097_v52  ;;  %1677 = vmatpush1.bf16.msra.mxu0 %v1676_v46  ;;  %v2124_v41 = vpop.permute.xlu1 %2123  ;;  %1683 = vmatprep.subr.bf16.mxu1 %v1682_v4  ;;  %v1678_v21 = vpack.c.bf16 %v1106_v0, %v1105_v58  ;;  %v1359_v24 = vsel %vm1358_vm8, %v2065_v34, %v2075_v43  ;;  %v1562_v58 = vld [vmem:[%s3130_s1 + $0x1c] sm:$0x7] }
 0x1d5   : > { %v2126_v20 = vunpack.i.h.bf16 %v2124_v41  ;;  %v2125_v11 = vunpack.i.l.bf16 %v2124_v41  ;;  %v1700_v60 = vpack.c.bf16 %v1360_v56, %v1359_v24  ;;  %v1361_v43 = vsel %vm1358_vm8, %v2090_v12, %v2095_v8 }
 0x1d6   : > { %1559 = vmatmul.mubr.msk.f32.vlgmr.msra.gmra.mrb[4].mxu1 %vm359_vm6, %v1558_v47  ;;  %1679 = vmatprep.subr.bf16.mxu0 %v1678_v21  ;;  %v1702_v19 = vpack.c.bf16 %v1370_v50, %v1369_v59  ;;  %v289_v41 = vadd.s32 128, %v2481_v27  ;;  %v3063_v21 = vcvt.s32.f32 %v2481_v27 }
 0x1d7   : > { %1685 = vmatpush1.bf16.msra.mxu1 %v1684_v18  ;;  %v1238_v34 = vsel %vm1225_vm7, %v2125_v11, %v2115_v36  ;;  %v1239_v45 = vsel %vm1225_vm7, %v2126_v20, %v2116_v37  ;;  %1309 = vmatprep.mubr.f32.mxu1 %v3138_v49  ;;  %v1231_v55 = vsel %vm1225_vm7, %v2116_v37, %v2126_v20 }
 0x1d8   : > { %1681 = vmatpush1.bf16.msra.mxu0 %v1680_v23  ;;  %v2134_v39 = vpop.permute.xlu1 %2133  ;;  %1687 = vmatprep.subr.bf16.mxu1 %v1686_v53  ;;  %v1230_v2 = vsel %vm1225_vm7, %v2115_v36, %v2125_v11  ;;  %v1690_v42 = vpack.c.bf16 %v1239_v45, %v1238_v34  ;;  %v1704_v36 = vpack.c.bf16 %v1362_v54, %v1361_v43  ;;  %v1564_v23 = vld [vmem:[%s3130_s1 + $0x20] sm:$0x7]  ;;  %v3065_v56 = vcvt.s32.f32 %v289_v41 }
 0x1d9   : > { %v2136_v63 = vunpack.i.h.bf16 %v2134_v39  ;;  %v2135_v6 = vunpack.i.l.bf16 %v2134_v39  ;;  %1699 = vmatprep.subr.bf16.mxu0 %v1698_v33  ;;  %v1692_v28 = vpack.c.bf16 %v1231_v55, %v1230_v2  ;;  %v293_v24 = vmul.f32 0.0625, %v3063_v21 }
 0x1da   : > { %v294_v20 = vmul.f32 0.0625, %v3065_v56  ;;  %vm301_vm9 = vcmp.ge.f32.partialorder %v3063_v21, 16.0  ;;  %vm302_vm11 = vcmp.ge.f32.partialorder %v3065_v56, 16.0  ;;  %vm303_vm3 = vcmp.lt.f32.partialorder %v3063_v21, 240.0 }
 0x1db   : > { %1561 = vmatmul.mubr.msk.f32.vlgmr.msra.gmra.mrb[6].mxu0 %vm359_vm6, %v1560_v13  ;;  %1689 = vmatpush1.bf16.msra.mxu1 %v1688_v62  ;;  %v1371_v40 = vsel %vm1358_vm8, %v2135_v6, %v2130_v5  ;;  %v1372_v37 = vsel %vm1358_vm8, %v2136_v63, %v2131_v9  ;;  %v1364_v46 = vsel %vm1358_vm8, %v2131_v9, %v2136_v63  ;;  %v295_v11 = vfloor.f32 %v293_v24 }
 0x1dc   : > { %1701 = vmatpush1.bf16.msra.mxu0 %v1700_v60  ;;  %v2144_v38 = vpop.permute.xlu1 %2143  ;;  %1691 = vmatprep.subr.bf16.mxu1 %v1690_v42  ;;  %v1363_v10 = vsel %vm1358_vm8, %v2130_v5, %v2135_v6  ;;  %v1706_v7 = vpack.c.bf16 %v1372_v37, %v1371_v40  ;;  %v296_v12 = vfloor.f32 %v294_v20  ;;  %vm304_vm4 = vcmp.lt.f32.partialorder %v3065_v56, 240.0 }
 0x1dd   : > { %v2146_v29 = vunpack.i.h.bf16 %v2144_v38  ;;  %v2145_v1 = vunpack.i.l.bf16 %v2144_v38  ;;  %1703 = vmatprep.subr.bf16.mxu0 %v1702_v19  ;;  %1442 = vmatprep.mubr.f32.mxu0 %v3138_v49  ;;  %v1708_v57 = vpack.c.bf16 %v1364_v46, %v1363_v10  ;;  %v297_v31 = vmul.f32 16.0, %v295_v11 }
 0x1de   : > { %v298_v44 = vmul.f32 16.0, %v296_v12 }
 0x1df   : > { %v1233_v3 = vsel %vm1225_vm7, %v2141_v16, %v2146_v29  ;;  %v1232_v17 = vsel %vm1225_vm7, %v2140_v35, %v2145_v1  ;;  %1693 = vmatpush1.bf16.msra.mxu1 %v1692_v28  ;;  %v1240_v18 = vsel %vm1225_vm7, %v2145_v1, %v2140_v35  ;;  %v1241_v49 = vsel %vm1225_vm7, %v2146_v29, %v2141_v16 }
 0x1e0   : > { %v1696_v15 = vpack.c.bf16 %v1233_v3, %v1232_v17  ;;  %1705 = vmatpush1.bf16.msra.mxu0 %v1704_v36  ;;  %v2154_v48 = vpop.permute.xlu1 %2153  ;;  %v1694_v4 = vpack.c.bf16 %v1241_v49, %v1240_v18  ;;  %v299_v53 = vsub.f32 %v3063_v21, %v297_v31  ;;  %v300_v34 = vsub.f32 %v3065_v56, %v298_v44 }
 0x1e1   : > { %v2156_v25 = vunpack.i.h.bf16 %v2154_v48  ;;  %v2155_v26 = vunpack.i.l.bf16 %v2154_v48  ;;  %1707 = vmatprep.subr.bf16.mxu0 %v1706_v7 }
 0x1e2   : > { %1695 = vmatprep.subr.bf16.mxu1 %v1694_v4  ;;  %vm305_vm10 = vcmp.ge.f32.partialorder %v299_v53, 1.0  ;;  %vm306_vm12 = vcmp.ge.f32.partialorder %v300_v34, 1.0  ;;  %vm307_vm15 = vcmp.le.f32.partialorder %v299_v53, 14.0  ;;  %vm308_vm0 = vcmp.le.f32.partialorder %v300_v34, 14.0 }
 0x1e3   : > { %v1366_v52 = vsel %vm1358_vm8, %v2151_v30, %v2156_v25  ;;  %v1365_v47 = vsel %vm1358_vm8, %v2150_v22, %v2155_v26  ;;  %1697 = vmatpush1.bf16.msra.mxu1 %v1696_v15  ;;  %v1373_v0 = vsel %vm1358_vm8, %v2155_v26, %v2150_v22  ;;  %v1374_v32 = vsel %vm1358_vm8, %v2156_v25, %v2151_v30  ;;  %vm434_vm13 = vmand %vm301_vm9, %vm305_vm10 }
 0x1e4   : > { %v1712_v51 = vpack.c.bf16 %v1366_v52, %v1365_v47  ;;  %1709 = vmatpush1.bf16.msra.mxu0 %v1708_v57  ;;  %v1710_v8 = vpack.c.bf16 %v1374_v32, %v1373_v0  ;;  %vm435_vm14 = vmand %vm302_vm11, %vm306_vm12 }
 0x1e5   : > { %vm702_vm1 = vmand %vm301_vm9, %vm307_vm15 }
 0x1e6   : > { %1563 = vmatmul.mubr.msk.f32.vlgmr.msra.gmra.mrb[6].mxu1 %vm359_vm6, %v1562_v58  ;;  %1711 = vmatprep.subr.bf16.mxu0 %v1710_v8  ;;  %vm703_vm2 = vmand %vm302_vm11, %vm308_vm0  ;;  %v1463_v58 = vpop.permute.xlu0 %1462 }
 0x1e7   : > { %vm1181_vm5 = vmand %vm303_vm3, %vm305_vm10 }
 0x1e8   : > { %1713 = vmatpush1.bf16.msra.mxu0 %v1712_v51  ;;  %vm1449_vm7 = vmand %vm303_vm3, %vm307_vm15 }
 0x1e9   : > { %vm1450_vm8 = vmand %vm304_vm4, %vm308_vm0 }
 0x1eb   : > { %1565 = vmatmul.mubr.msk.f32.vlgmr.msra.gmra.mrb[8].mxu0 %vm359_vm6, %v1564_v23  ;;  %vm1182_vm6 = vmand %vm304_vm4, %vm306_vm12 }
 0x27d   : > { %v429_v33 = vpop.f32.mrb[0].mxu0 }
 0x27e   : > { %v431_v45 = vpop.f32.mrb[1].mxu0  ;;  %v440_v9 = vsel %vm434_vm13, %v429_v33, 0.0 }
 0x27f   : > { %v441_v39 = vsel %vm435_vm14, %v431_v45, 0.0 }
 0x285   : > { %v564_v27 = vpop.f32.mrb[0].mxu1 }
 0x286   : > { %v573_v5 = vsel %vm301_vm9, %v564_v27, 0.0  ;;  %v566_v61 = vpop.f32.mrb[1].mxu1 }
 0x287   : > { %v575_v13 = vadd.f32 %v573_v5, %v440_v9  ;;  %v574_v59 = vsel %vm302_vm11, %v566_v61, 0.0 }
 0x288   : > { %v576_v50 = vadd.f32 %v574_v59, %v441_v39 }
 0x28e   : > { %v697_v60 = vpop.f32.mrb[2].mxu0 }
 0x28f   : > { %v708_v62 = vsel %vm702_vm1, %v697_v60, 0.0  ;;  %v699_v63 = vpop.f32.mrb[3].mxu0 }
 0x290   : > { %v710_v6 = vadd.f32 %v708_v62, %v575_v13  ;;  %v709_v54 = vsel %vm703_vm2, %v699_v63, 0.0 }
 0x291   : > { %v711_v55 = vadd.f32 %v709_v54, %v576_v50 }
 0x299   : > { %v832_v2 = vpop.f32.mrb[2].mxu1 }
 0x29a   : > { %v841_v42 = vsel %vm305_vm10, %v832_v2, 0.0  ;;  %v834_v43 = vpop.f32.mrb[3].mxu1 }
 0x29b   : > { %v843_v19 = vadd.f32 %v841_v42, %v710_v6  ;;  %v842_v40 = vsel %vm306_vm12, %v834_v43, 0.0 }
 0x29c   : > { %v844_v16 = vadd.f32 %v842_v40, %v711_v55 }
 0x29e   : > { %v916_v38 = vpop.f32.mrb[4].mxu0 }
 0x29f   : > { %v921_v37 = vadd.f32 %v916_v38, %v843_v19  ;;  %v918_v35 = vpop.f32.mrb[5].mxu0 }
 0x2a0   : > { %v922_v28 = vadd.f32 %v918_v35, %v844_v16 }
 0x2a9   : > { %v1043_v29 = vpop.f32.mrb[4].mxu1 }
 0x2aa   : > { %v1052_v1 = vsel %vm307_vm15, %v1043_v29, 0.0  ;;  %v1045_v14 = vpop.f32.mrb[5].mxu1 }
 0x2ab   : > { %v1054_v36 = vadd.f32 %v1052_v1, %v921_v37  ;;  %v1053_v46 = vsel %vm308_vm0, %v1045_v14, 0.0 }
 0x2ac   : > { %v1055_v10 = vadd.f32 %v1053_v46, %v922_v28 }
 0x2ae   : > { %v1176_v7 = vpop.f32.mrb[6].mxu0 }
 0x2af   : > { %v1187_v3 = vsel %vm1181_vm5, %v1176_v7, 0.0  ;;  %v1178_v17 = vpop.f32.mrb[7].mxu0 }
 0x2b0   : > { %v1189_v18 = vadd.f32 %v1187_v3, %v1054_v36  ;;  %v1188_v49 = vsel %vm1182_vm6, %v1178_v17, 0.0 }
 0x2b1   : > { %v1190_v15 = vadd.f32 %v1188_v49, %v1055_v10 }
 0x2b9   : > { %v1311_v48 = vpop.f32.mrb[6].mxu1 }
 0x2ba   : > { %v1320_v4 = vsel %vm303_vm3, %v1311_v48, 0.0  ;;  %v1313_v30 = vpop.f32.mrb[7].mxu1 }
 0x2bb   : > { %v1322_v22 = vadd.f32 %v1320_v4, %v1189_v18  ;;  %v1321_v25 = vsel %vm304_vm4, %v1313_v30, 0.0 }
 0x2bc   : > { %v1323_v26 = vadd.f32 %v1321_v25, %v1190_v15 }
 0x2be   : > { %v1444_v57 = vpop.f32.mrb[8].mxu0 }
 0x2bf   : > { %v1455_v52 = vsel %vm1449_vm7, %v1444_v57, 0.0  ;;  %v1446_v47 = vpop.f32.mrb[9].mxu0 }
 0x2c0   : > { %v1457_v0 = vadd.f32 %v1455_v52, %v1322_v22  ;;  %v1456_v32 = vsel %vm1450_vm8, %v1446_v47, 0.0 }
 0x2c1   : > { %v1458_v51 = vadd.f32 %v1456_v32, %v1323_v26 }
 0x2c2   : > { %v1465_v8 = vadd.f32 %v1463_v58, %v1457_v0 }
 0x2c3   : > { %v1466_v23 = vadd.f32 %v1463_v58, %v1458_v51 }
 0x2c5   : > { %v1469_v41 = vcombine.low %v1465_v8, %v1466_v23 }
 0x2c7   : > { %1471 = vst [vmem:[%s190_s8] sm:$0x77] %v1469_v41 }
 0x2c8 PF: > { %p13_p8 = scmp.ge.s32.totalorder %s2279_s17, 4   ;;  %s3149_s12 = smov %s2214_s13 }
 0x2c9   : > { %s3150_s13 = smov %s2218_s14  ;;  %s3151_s14 = smov %s2289_s20 }
 0x2ca   : > { %s3152_s15 = smov %s2279_s17  ;;  %15 = sbr.rel (!%p13_p8) target bundleno = 3 (0x3), region = 80 }
 0x2d1   :  { %1493 = vsyncpa [#allocation3], 1 }
 0x2d2   :  { %1495 = vsyncpa [#allocation3 + $0x1], 1 }

</bundles_post_ra>
